<compile_context>
chip_gen: v6e
topology: v6e:2x2x1
jax: 0.10.0
libtpu: 0.0.40
codegen_flags: <defaults>
</compile_context>

<pallas_src>
import jax
import jax.numpy as jnp
from jax.experimental import pallas as pl
from jax.experimental.pallas import tpu as pltpu

UNITS = 512


def _block_kernel(x_ref,
                  w1_ref, b1_ref,
                  w2_ref, b2_ref,
                  w3_ref, b3_ref,
                  w4_ref, b4_ref,
                  w5_ref, b5_ref,
                  o_ref):
    """Fused forward chain: 5x (bf16 MXU matmul -> f32 bias + ReLU)."""

    def layer(h_bf16, w_ref, b_ref):
        acc = jnp.dot(h_bf16, w_ref[...], preferred_element_type=jnp.float32)
        return jnp.maximum(acc + b_ref[...], 0.0)      # bias + ReLU on f32 accumulator

    h = layer(x_ref[...], w1_ref, b1_ref)              # fc1 -> relu -> dropout(id)
    h = layer(h.astype(jnp.bfloat16), w2_ref, b2_ref)  # fc2 -> relu -> dropout(id)
    h = layer(h.astype(jnp.bfloat16), w3_ref, b3_ref)  # fc3 -> relu -> dropout(id)
    h = layer(h.astype(jnp.bfloat16), w4_ref, b4_ref)  # fc4 -> relu -> dropout(id)
    h = layer(h.astype(jnp.bfloat16), w5_ref, b5_ref)  # fc5 -> relu -> dropout(id)

    o_ref[...] = h.astype(o_ref.dtype)


def block_forward(x, params, *, batch_tile=256):
    """x: (B, seq_len). params: w1..w5 bf16 (in,out), b1..b5 f32 (1,out). Returns (B, 512) f32."""
    B, seq_len = x.shape
    x = x.astype(jnp.bfloat16)

    # Batch tile: 256 rows fills the v6e/v7x MXU (and is 2x the v5e MXU height);
    # for tiny batches a single full-extent block satisfies the (8,128) tiling rule.
    TB = batch_tile if B >= batch_tile else B
    grid = (pl.cdiv(B, TB),)

    def resident_spec(shape):
        # Full-array block, constant block index -> stays VMEM-resident across batch tiles.
        return pl.BlockSpec(shape, lambda i, _s=shape: (0,) * len(_s))

    weight_names = ("w1", "b1", "w2", "b2", "w3", "b3", "w4", "b4", "w5", "b5")

    in_specs = [pl.BlockSpec((TB, seq_len), lambda i: (i, 0))]
    in_specs += [resident_spec(params[name].shape) for name in weight_names]

    args = (x,) + tuple(params[name] for name in weight_names)

    return pl.pallas_call(
        _block_kernel,
        out_shape=jax.ShapeDtypeStruct((B, UNITS), jnp.float32),
        grid=grid,
        in_specs=in_specs,
        out_specs=pl.BlockSpec((TB, UNITS), lambda i: (i, 0)),
        compiler_params=pltpu.CompilerParams(
            dimension_semantics=("parallel",),
            vmem_limit_bytes=32 << 20,
        ),
    )(*args)


def init_params(key, seq_len):
    """Deterministic synthetic parameters matching nn.Linear shapes.

    PyTorch stores Linear weight as (out, in); we store the transpose (in, out)
    in bfloat16 so the kernel computes x @ W directly on the MXU. Biases stay
    float32 (tiny) and are added to the f32 accumulator.
    """
    ks = jax.random.split(key, 10)
    scale = 0.02

    def w(k, fan_in, fan_out):
        return (scale * jax.random.normal(k, (fan_in, fan_out))).astype(jnp.bfloat16)

    def b(k, fan_out):
        # keep biases 2D (1, out) so they live as (sublane, lane) tiles
        return (scale * jax.random.normal(k, (1, fan_out))).astype(jnp.float32)

    return {
        "w1": w(ks[0], seq_len, UNITS), "b1": b(ks[1], UNITS),
        "w2": w(ks[2], UNITS, UNITS),   "b2": b(ks[3], UNITS),
        "w3": w(ks[4], UNITS, UNITS),   "b3": b(ks[5], UNITS),
        "w4": w(ks[6], UNITS, UNITS),   "b4": b(ks[7], UNITS),
        "w5": w(ks[8], UNITS, UNITS),   "b5": b(ks[9], UNITS),
    }


def reference_forward(x, params):
    """Pure-JAX reference with identical bf16/f32 mixed-precision semantics."""
    h = x.astype(jnp.bfloat16)
    acc = None
    for i in range(1, 6):
        acc = jnp.maximum(
            jnp.dot(h, params[f"w{i}"], preferred_element_type=jnp.float32)
            + params[f"b{i}"],
            0.0,
        )
        h = acc.astype(jnp.bfloat16)
    return acc


if __name__ == "__main__":
    key = jax.random.PRNGKey(0)
    k_x, k_p = jax.random.split(key)

    batch = 2
    seq_len = 8      # backcast_length
    pred_len = 4     # forecast_length (unused in forward; kept for module parity)
    thetas_dim = 3   # unused in forward (theta_b_fc / theta_f_fc not applied in Block.forward)

    x = jax.random.normal(k_x, (batch, seq_len), dtype=jnp.float32)
    params = init_params(k_p, seq_len)

    out = block_forward(x, params)
    out = jax.block_until_ready(out)

    ref = reference_forward(x, params)
    assert out.shape == (batch, UNITS)
    assert jnp.allclose(out, ref, atol=2e-2, rtol=2e-2), "mismatch vs reference"

    print("KERNEL_OK")
</pallas_src>

<mosaic_0001>
module attributes {stable_mosaic.version = 11 : i64} {
  func.func @_block_kernel(%arg0: i32, %arg1: memref<2x8xbf16, #tpu.memory_space<vmem>>, %arg2: memref<8x512xbf16, #tpu.memory_space<vmem>>, %arg3: memref<1x512xf32, #tpu.memory_space<vmem>>, %arg4: memref<512x512xbf16, #tpu.memory_space<vmem>>, %arg5: memref<1x512xf32, #tpu.memory_space<vmem>>, %arg6: memref<512x512xbf16, #tpu.memory_space<vmem>>, %arg7: memref<1x512xf32, #tpu.memory_space<vmem>>, %arg8: memref<512x512xbf16, #tpu.memory_space<vmem>>, %arg9: memref<1x512xf32, #tpu.memory_space<vmem>>, %arg10: memref<512x512xbf16, #tpu.memory_space<vmem>>, %arg11: memref<1x512xf32, #tpu.memory_space<vmem>>, %arg12: memref<2x512xf32, #tpu.memory_space<vmem>>) attributes {dimension_semantics = [#tpu.dimension_semantics<parallel>], iteration_bounds = array<i64: 1>, scalar_prefetch = 0 : i64, scratch_operands = 0 : i64, tpu.core_type = #tpu.core_type<tc>, window_params = [{transform_indices = @transform_0, window_bounds = array<i64: 2, 8>}, {pipeline_mode = #tpu.pipeline_mode<synchronous>, transform_indices = @transform_1, window_bounds = array<i64: 8, 512>}, {pipeline_mode = #tpu.pipeline_mode<synchronous>, transform_indices = @transform_2, window_bounds = array<i64: 1, 512>}, {pipeline_mode = #tpu.pipeline_mode<synchronous>, transform_indices = @transform_3, window_bounds = array<i64: 512, 512>}, {pipeline_mode = #tpu.pipeline_mode<synchronous>, transform_indices = @transform_4, window_bounds = array<i64: 1, 512>}, {pipeline_mode = #tpu.pipeline_mode<synchronous>, transform_indices = @transform_5, window_bounds = array<i64: 512, 512>}, {pipeline_mode = #tpu.pipeline_mode<synchronous>, transform_indices = @transform_6, window_bounds = array<i64: 1, 512>}, {pipeline_mode = #tpu.pipeline_mode<synchronous>, transform_indices = @transform_7, window_bounds = array<i64: 512, 512>}, {pipeline_mode = #tpu.pipeline_mode<synchronous>, transform_indices = @transform_8, window_bounds = array<i64: 1, 512>}, {pipeline_mode = #tpu.pipeline_mode<synchronous>, transform_indices = @transform_9, window_bounds = array<i64: 512, 512>}, {pipeline_mode = #tpu.pipeline_mode<synchronous>, transform_indices = @transform_10, window_bounds = array<i64: 1, 512>}, {transform_indices = @transform_11, window_bounds = array<i64: 2, 512>}]} {
    %c0 = arith.constant 0 : index
    %c0_0 = arith.constant 0 : index
    %0 = vector.load %arg1[%c0, %c0_0] : memref<2x8xbf16, #tpu.memory_space<vmem>>, vector<2x8xbf16>
    %c0_1 = arith.constant 0 : index
    %c0_2 = arith.constant 0 : index
    %1 = vector.load %arg2[%c0_1, %c0_2] : memref<8x512xbf16, #tpu.memory_space<vmem>>, vector<8x512xbf16>
    %cst = arith.constant dense<0.000000e+00> : vector<2x512xf32>
    %2 = tpu.matmul %0, %1, %cst {dimension_numbers = #tpu.dot_dimension_numbers<[1], [0], [0], [1], [0, 0, 1, 1], [], []>} : vector<2x8xbf16>, vector<8x512xbf16>, vector<2x512xf32> -> vector<2x512xf32>
    %c0_3 = arith.constant 0 : index
    %c0_4 = arith.constant 0 : index
    %3 = vector.load %arg3[%c0_3, %c0_4] : memref<1x512xf32, #tpu.memory_space<vmem>>, vector<1x512xf32>
    %4 = vector.broadcast %3 : vector<1x512xf32> to vector<2x512xf32>
    %5 = arith.addf %2, %4 : vector<2x512xf32>
    %cst_5 = arith.constant 0.000000e+00 : f32
    %6 = vector.broadcast %cst_5 : f32 to vector<2x512xf32>
    %7 = arith.maximumf %5, %6 : vector<2x512xf32>
    %8 = arith.truncf %7 : vector<2x512xf32> to vector<2x512xbf16>
    %c0_6 = arith.constant 0 : index
    %c0_7 = arith.constant 0 : index
    %9 = vector.load %arg4[%c0_6, %c0_7] : memref<512x512xbf16, #tpu.memory_space<vmem>>, vector<512x512xbf16>
    %cst_8 = arith.constant dense<0.000000e+00> : vector<2x512xf32>
    %10 = tpu.matmul %8, %9, %cst_8 {dimension_numbers = #tpu.dot_dimension_numbers<[1], [0], [0], [1], [0, 0, 1, 1], [], []>} : vector<2x512xbf16>, vector<512x512xbf16>, vector<2x512xf32> -> vector<2x512xf32>
    %c0_9 = arith.constant 0 : index
    %c0_10 = arith.constant 0 : index
    %11 = vector.load %arg5[%c0_9, %c0_10] : memref<1x512xf32, #tpu.memory_space<vmem>>, vector<1x512xf32>
    %12 = vector.broadcast %11 : vector<1x512xf32> to vector<2x512xf32>
    %13 = arith.addf %10, %12 : vector<2x512xf32>
    %cst_11 = arith.constant 0.000000e+00 : f32
    %14 = vector.broadcast %cst_11 : f32 to vector<2x512xf32>
    %15 = arith.maximumf %13, %14 : vector<2x512xf32>
    %16 = arith.truncf %15 : vector<2x512xf32> to vector<2x512xbf16>
    %c0_12 = arith.constant 0 : index
    %c0_13 = arith.constant 0 : index
    %17 = vector.load %arg6[%c0_12, %c0_13] : memref<512x512xbf16, #tpu.memory_space<vmem>>, vector<512x512xbf16>
    %cst_14 = arith.constant dense<0.000000e+00> : vector<2x512xf32>
    %18 = tpu.matmul %16, %17, %cst_14 {dimension_numbers = #tpu.dot_dimension_numbers<[1], [0], [0], [1], [0, 0, 1, 1], [], []>} : vector<2x512xbf16>, vector<512x512xbf16>, vector<2x512xf32> -> vector<2x512xf32>
    %c0_15 = arith.constant 0 : index
    %c0_16 = arith.constant 0 : index
    %19 = vector.load %arg7[%c0_15, %c0_16] : memref<1x512xf32, #tpu.memory_space<vmem>>, vector<1x512xf32>
    %20 = vector.broadcast %19 : vector<1x512xf32> to vector<2x512xf32>
    %21 = arith.addf %18, %20 : vector<2x512xf32>
    %cst_17 = arith.constant 0.000000e+00 : f32
    %22 = vector.broadcast %cst_17 : f32 to vector<2x512xf32>
    %23 = arith.maximumf %21, %22 : vector<2x512xf32>
    %24 = arith.truncf %23 : vector<2x512xf32> to vector<2x512xbf16>
    %c0_18 = arith.constant 0 : index
    %c0_19 = arith.constant 0 : index
    %25 = vector.load %arg8[%c0_18, %c0_19] : memref<512x512xbf16, #tpu.memory_space<vmem>>, vector<512x512xbf16>
    %cst_20 = arith.constant dense<0.000000e+00> : vector<2x512xf32>
    %26 = tpu.matmul %24, %25, %cst_20 {dimension_numbers = #tpu.dot_dimension_numbers<[1], [0], [0], [1], [0, 0, 1, 1], [], []>} : vector<2x512xbf16>, vector<512x512xbf16>, vector<2x512xf32> -> vector<2x512xf32>
    %c0_21 = arith.constant 0 : index
    %c0_22 = arith.constant 0 : index
    %27 = vector.load %arg9[%c0_21, %c0_22] : memref<1x512xf32, #tpu.memory_space<vmem>>, vector<1x512xf32>
    %28 = vector.broadcast %27 : vector<1x512xf32> to vector<2x512xf32>
    %29 = arith.addf %26, %28 : vector<2x512xf32>
    %cst_23 = arith.constant 0.000000e+00 : f32
    %30 = vector.broadcast %cst_23 : f32 to vector<2x512xf32>
    %31 = arith.maximumf %29, %30 : vector<2x512xf32>
    %32 = arith.truncf %31 : vector<2x512xf32> to vector<2x512xbf16>
    %c0_24 = arith.constant 0 : index
    %c0_25 = arith.constant 0 : index
    %33 = vector.load %arg10[%c0_24, %c0_25] : memref<512x512xbf16, #tpu.memory_space<vmem>>, vector<512x512xbf16>
    %cst_26 = arith.constant dense<0.000000e+00> : vector<2x512xf32>
    %34 = tpu.matmul %32, %33, %cst_26 {dimension_numbers = #tpu.dot_dimension_numbers<[1], [0], [0], [1], [0, 0, 1, 1], [], []>} : vector<2x512xbf16>, vector<512x512xbf16>, vector<2x512xf32> -> vector<2x512xf32>
    %c0_27 = arith.constant 0 : index
    %c0_28 = arith.constant 0 : index
    %35 = vector.load %arg11[%c0_27, %c0_28] : memref<1x512xf32, #tpu.memory_space<vmem>>, vector<1x512xf32>
    %36 = vector.broadcast %35 : vector<1x512xf32> to vector<2x512xf32>
    %37 = arith.addf %34, %36 : vector<2x512xf32>
    %cst_29 = arith.constant 0.000000e+00 : f32
    %38 = vector.broadcast %cst_29 : f32 to vector<2x512xf32>
    %39 = arith.maximumf %37, %38 : vector<2x512xf32>
    %c0_30 = arith.constant 0 : index
    %c0_31 = arith.constant 0 : index
    %40 = vector.load %arg12[%c0_30, %c0_31] : memref<2x512xf32, #tpu.memory_space<vmem>>, vector<2x512xf32>
    tpu.vector_store %arg12[%c0_30, %c0_31], %39 {strides = array<i32>} : memref<2x512xf32, #tpu.memory_space<vmem>>, vector<2x512xf32>,
    return
  }
  func.func @transform_0(%arg0: i32) -> (i32, i32) {
    %c0_i32 = arith.constant 0 : i32
    %c0_i32_0 = arith.constant 0 : i32
    return %arg0, %c0_i32 : i32, i32
  }
  func.func @transform_1(%arg0: i32) -> (i32, i32) {
    %c0_i32 = arith.constant 0 : i32
    %c0_i32_0 = arith.constant 0 : i32
    %c0_i32_1 = arith.constant 0 : i32
    return %c0_i32, %c0_i32_0 : i32, i32
  }
  func.func @transform_2(%arg0: i32) -> (i32, i32) {
    %c0_i32 = arith.constant 0 : i32
    %c0_i32_0 = arith.constant 0 : i32
    %c0_i32_1 = arith.constant 0 : i32
    return %c0_i32, %c0_i32_0 : i32, i32
  }
  func.func @transform_3(%arg0: i32) -> (i32, i32) {
    %c0_i32 = arith.constant 0 : i32
    %c0_i32_0 = arith.constant 0 : i32
    %c0_i32_1 = arith.constant 0 : i32
    return %c0_i32, %c0_i32_0 : i32, i32
  }
  func.func @transform_4(%arg0: i32) -> (i32, i32) {
    %c0_i32 = arith.constant 0 : i32
    %c0_i32_0 = arith.constant 0 : i32
    %c0_i32_1 = arith.constant 0 : i32
    return %c0_i32, %c0_i32_0 : i32, i32
  }
  func.func @transform_5(%arg0: i32) -> (i32, i32) {
    %c0_i32 = arith.constant 0 : i32
    %c0_i32_0 = arith.constant 0 : i32
    %c0_i32_1 = arith.constant 0 : i32
    return %c0_i32, %c0_i32_0 : i32, i32
  }
  func.func @transform_6(%arg0: i32) -> (i32, i32) {
    %c0_i32 = arith.constant 0 : i32
    %c0_i32_0 = arith.constant 0 : i32
    %c0_i32_1 = arith.constant 0 : i32
    return %c0_i32, %c0_i32_0 : i32, i32
  }
  func.func @transform_7(%arg0: i32) -> (i32, i32) {
    %c0_i32 = arith.constant 0 : i32
    %c0_i32_0 = arith.constant 0 : i32
    %c0_i32_1 = arith.constant 0 : i32
    return %c0_i32, %c0_i32_0 : i32, i32
  }
  func.func @transform_8(%arg0: i32) -> (i32, i32) {
    %c0_i32 = arith.constant 0 : i32
    %c0_i32_0 = arith.constant 0 : i32
    %c0_i32_1 = arith.constant 0 : i32
    return %c0_i32, %c0_i32_0 : i32, i32
  }
  func.func @transform_9(%arg0: i32) -> (i32, i32) {
    %c0_i32 = arith.constant 0 : i32
    %c0_i32_0 = arith.constant 0 : i32
    %c0_i32_1 = arith.constant 0 : i32
    return %c0_i32, %c0_i32_0 : i32, i32
  }
  func.func @transform_10(%arg0: i32) -> (i32, i32) {
    %c0_i32 = arith.constant 0 : i32
    %c0_i32_0 = arith.constant 0 : i32
    %c0_i32_1 = arith.constant 0 : i32
    return %c0_i32, %c0_i32_0 : i32, i32
  }
  func.func @transform_11(%arg0: i32) -> (i32, i32) {
    %c0_i32 = arith.constant 0 : i32
    %c0_i32_0 = arith.constant 0 : i32
    return %arg0, %c0_i32 : i32, i32
  }
}

</mosaic_0001>

<bundles_post_ra>
// kernel: tpu_custom_call.1
= control target key start
LH: loop header
LB: loop body
LE: loop exit
PB: predicated region body
PF: predicated region fallthrough
CT: control target
= control target key end

     0   :  { %16 = vsyncpa [#allocation3], 0  ;;  %s5847_s0 = inlined_call_operand.hbm [shape: bf16[2,8], index: 0, kind: input, shape index: {}]   ;;  %s5848_s1 = inlined_call_operand.hbm [shape: bf16[8,512], index: 1, kind: input, shape index: {}]   ;;  %s5849_s2 = inlined_call_operand.hbm [shape: f32[1,512], index: 2, kind: input, shape index: {}]   ;;  %s5850_s3 = inlined_call_operand.hbm [shape: bf16[512,512], index: 3, kind: input, shape index: {}]   ;;  %s5851_s4 = inlined_call_operand.vmem [shape: f32[1,512], index: 4, kind: input, shape index: {}]   ;;  %s5852_s5 = inlined_call_operand.hbm [shape: bf16[512,512], index: 5, kind: input, shape index: {}]   ;;  %s5853_s6 = inlined_call_operand.vmem [shape: f32[1,512], index: 6, kind: input, shape index: {}]   ;;  %s5854_s7 = inlined_call_operand.hbm [shape: bf16[512,512], index: 7, kind: input, shape index: {}]   ;;  %s5855_s8 = inlined_call_operand.vmem [shape: f32[1,512], index: 8, kind: input, shape index: {}]   ;;  %s5856_s9 = inlined_call_operand.hbm [shape: bf16[512,512], index: 9, kind: input, shape index: {}]   ;;  %s5857_s10 = inlined_call_operand.vmem [shape: f32[1,512], index: 10, kind: input, shape index: {}]   ;;  %s5858_s11 = inlined_call_operand.hbm [shape: f32[2,512], index: 11, kind: output, shape index: {}]  }
   0x1   :  { %17 = vsyncpa [#allocation6], 0 }
   0x2   :  { %18 = vsyncpa [#allocation9], 0 }
   0x3   :  { %19 = vsyncpa [#allocation12], 0 }
   0x4   :  { %20 = vsyncpa [#allocation4], 0  ;;  %s5630_s17 = smov [#allocation5]   ;;  %s5631_s19 = smov [#allocation8]  }
   0x5   :  { %s37_s18 = sshll.u32 %s5630_s17, 4  ;;  %s56_s20 = sshll.u32 %s5631_s19, 4  ;;  %s38_s18 = int_to_ptr.vmem [resolvable:$true] %s37_s18  ;;  %s57_s20 = int_to_ptr.vmem [resolvable:$true] %s56_s20 }
   0x6   :  { %s5468_s21 = scalar_lea.vmem %s38_s18, 256  ;;  %p5473_p1 = scmp.lt.s32.totalorder %s38_s18, %s38_s18 }
   0x7   :  { %p5469_p0 = scmp.ne.s32.totalorder %s38_s18, %s5468_s21  ;;  %p5474_p2 = scmp.lt.s32.totalorder %s5468_s21, %s5468_s21 }
   0x9   :  { %p5475_p3 = por %p5474_p2, %p5473_p1 }
   0xb   :  { %p5476_p4 = pnand %p5475_p3, %p5469_p0 }
   0xd   :  { %5479 = shalt.err (!%p5476_p4)
}
   0xe   :  { %40 = dma.hbm_to_vmem [thread:$0]  %s5848_s1, 256, %s38_s18, [#allocation6]  }
   0xf   :  { %s5488_s24 = scalar_lea.vmem %s57_s20, 16384  ;;  %p5493_p6 = scmp.lt.s32.totalorder %s57_s20, %s57_s20 }
  0x10   :  { %p5489_p5 = scmp.ne.s32.totalorder %s57_s20, %s5488_s24  ;;  %p5494_p7 = scmp.lt.s32.totalorder %s5488_s24, %s5488_s24 }
  0x12   :  { %p5495_p8 = por %p5494_p7, %p5493_p6 }
  0x14   :  { %p5496_p9 = pnand %p5495_p8, %p5489_p5 }
  0x16   :  { %5499 = shalt.err (!%p5496_p9)
}
  0x17   :  { %s5632_s25 = smov 256   ;;  %s5633_s26 = smov 16  }
  0x18   :  { %62 = dma.hbm_to_vmem [thread:$0]  %s5850_s3, 16384, %s57_s20, [#allocation9], %s5632_s25, %s5632_s25, %s5633_s26  }
  0x19   :  { %s5634_s29 = smov [#allocation11]   ;;  %s5635_s12 = smov [#allocation2]  }
  0x1a   :  { %s84_s30 = sshll.u32 %s5634_s29, 4  ;;  %s27_s1 = sshll.u32 %s5635_s12, 4  ;;  %s85_s30 = int_to_ptr.vmem [resolvable:$true] %s84_s30  ;;  %s28_s1 = int_to_ptr.vmem [resolvable:$true] %s27_s1 }
  0x1b   :  { %s5508_s13 = scalar_lea.vmem %s85_s30, 16384  ;;  %p5513_p11 = scmp.lt.s32.totalorder %s85_s30, %s85_s30 }
  0x1c   :  { %p5509_p10 = scmp.ne.s32.totalorder %s85_s30, %s5508_s13  ;;  %p5514_p12 = scmp.lt.s32.totalorder %s5508_s13, %s5508_s13 }
  0x1e   :  { %p5515_p13 = por %p5514_p12, %p5513_p11 }
  0x20   :  { %p5516_p0 = pnand %p5515_p13, %p5509_p10 }
  0x22   :  { %5519 = shalt.err (!%p5516_p0)
}
  0x23   :  { %90 = dma.hbm_to_vmem [thread:$0]  %s5854_s7, 16384, %s85_s30, [#allocation12], %s5632_s25, %s5632_s25, %s5633_s26  }
  0x24   :  { %s5528_s3 = scalar_lea.vmem %s28_s1, 16  ;;  %s5532_s16 = scalar_lea.vmem %s28_s1, 32 }
  0x25   :  { %p5529_p1 = scmp.ne.s32.totalorder %s28_s1, %s5528_s3  ;;  %p5533_p2 = scmp.lt.s32.totalorder %s28_s1, %s28_s1 }
  0x26   :  { %p5534_p3 = scmp.lt.s32.totalorder %s5532_s16, %s5528_s3 }
  0x28   :  { %p5535_p4 = por %p5534_p3, %p5533_p2 }
  0x2a   :  { %p5536_p5 = pnand %p5535_p4, %p5529_p1 }
  0x2c   :  { %5539 = shalt.err (!%p5536_p5)
}
  0x2d   :  { %30 = dma.hbm_to_vmem [thread:$0]  %s5847_s0, 16, %s28_s1, [#allocation3]  }
  0x2e   :  { %s5636_s19 = smov [#allocation7]   ;;  %s5637_s21 = smov [#allocation10]  }
  0x2f   :  { %s47_s20 = sshll.u32 %s5636_s19, 4  ;;  %s70_s22 = sshll.u32 %s5637_s21, 4  ;;  %s48_s20 = int_to_ptr.vmem [resolvable:$true] %s47_s20  ;;  %s71_s22 = int_to_ptr.vmem [resolvable:$true] %s70_s22 }
  0x30   :  { %s5548_s23 = scalar_lea.vmem %s48_s20, 64  ;;  %p5553_p7 = scmp.lt.s32.totalorder %s48_s20, %s48_s20 }
  0x31   :  { %p5549_p6 = scmp.ne.s32.totalorder %s48_s20, %s5548_s23  ;;  %p5554_p8 = scmp.lt.s32.totalorder %s5548_s23, %s5548_s23 }
  0x33   :  { %p5555_p9 = por %p5554_p8, %p5553_p7 }
  0x35   :  { %p5556_p10 = pnand %p5555_p9, %p5549_p6 }
  0x37   :  { %5559 = shalt.err (!%p5556_p10)
}
  0x38   :  { %50 = dma.hbm_to_vmem [thread:$0]  %s5849_s2, 64, %s48_s20, [#allocation6]  }
  0x39   :  { %s5568_s27 = scalar_lea.vmem %s71_s22, 16384  ;;  %p5573_p12 = scmp.lt.s32.totalorder %s71_s22, %s71_s22 }
  0x3a   :  { %p5569_p11 = scmp.ne.s32.totalorder %s71_s22, %s5568_s27  ;;  %p5574_p13 = scmp.lt.s32.totalorder %s5568_s27, %s5568_s27 }
  0x3c   :  { %p5575_p0 = por %p5574_p13, %p5573_p12 }
  0x3e   :  { %p5576_p1 = pnand %p5575_p0, %p5569_p11 }
  0x40   :  { %5579 = shalt.err (!%p5576_p1)
}
  0x41   :  { %76 = dma.hbm_to_vmem [thread:$0]  %s5852_s5, 16384, %s71_s22, [#allocation9], %s5632_s25, %s5632_s25, %s5633_s26  }
  0x42   :  { %s5638_s29 = smov [#allocation13]  }
  0x43   :  { %s98_s30 = sshll.u32 %s5638_s29, 4  ;;  %s99_s30 = int_to_ptr.vmem [resolvable:$true] %s98_s30 }
  0x44   :  { %s5588_s12 = scalar_lea.vmem %s99_s30, 16384  ;;  %p5593_p3 = scmp.lt.s32.totalorder %s99_s30, %s99_s30 }
  0x45   :  { %p5589_p2 = scmp.ne.s32.totalorder %s99_s30, %s5588_s12  ;;  %p5594_p4 = scmp.lt.s32.totalorder %s5588_s12, %s5588_s12 }
  0x47   :  { %p5595_p5 = por %p5594_p4, %p5593_p3 }
  0x49   :  { %p5596_p6 = pnand %p5595_p5, %p5589_p2 }
  0x4b   :  { %5599 = shalt.err (!%p5596_p6)
}
  0x4c   :  { %104 = dma.hbm_to_vmem [thread:$0]  %s5856_s9, 16384, %s99_s30, [#allocation12], %s5632_s25, %s5632_s25, %s5633_s26  }
  0x4d   :  { %5620 = dma.done.wait [#allocation3], 16  }
  0x4e   :  { %5621 = vsyncadd [#allocation3], 4294967280 }
  0x4f   :  { %5622 = dma.done.wait [#allocation6], 320  }
  0x50   :  { %5623 = vsyncadd [#allocation6], 4294966976 }
  0x51   :  { %5624 = dma.done.wait [#allocation9], 32768  }
  0x52   :  { %5625 = vsyncadd [#allocation9], 4294934528 }
  0x53   :  { %5626 = dma.done.wait [#allocation12], 32768  }
  0x54   :  { %5627 = vsyncadd [#allocation12], 4294934528  ;;  %v5639_v0 = vmov 0   ;;  %v130_v1 = vld [vmem:[#allocation5] sm:$0xff]  ;;  %vm168_vm0 = vcmask 1043456   ;;  %v131_v2 = vld [vmem:[#allocation5 + $0x8] sm:$0xff] }
  0x55   :  { %213 = vmatprep.mubr.bf16.mxu0 %v5639_v0  ;;  %254 = vmatprep.mubr.bf16.mxu1 %v5639_v0  ;;  %v4157_v3 = vcombine.high %v130_v1, %v130_v1  ;;  %v4159_v4 = vcombine.high %v131_v2, %v131_v2  ;;  %v4156_v5 = vcombine.low %v130_v1, %v130_v1  ;;  %v129_v7 = vld [vmem:[#allocation2] sm:$0x1]  ;;  %v4694_v8 = vld [vmem:[#allocation8 + $0xe4] ss:$16 sps:$4 sm:$0xff]   ;;  %v4692_v11 = vld [vmem:[#allocation8 + $0xe0] ss:$16 sps:$4 sm:$0xff]  }
  0x56   :  { %v4158_v6 = vcombine.low %v131_v2, %v131_v2  ;;  %v4697_v12 = vld [vmem:[#allocation8 + $0x2e4] ss:$16 sps:$4 sm:$0xff]   ;;  %vm164_vm1 = vcmask 64512   ;;  %v4695_v13 = vld [vmem:[#allocation8 + $0x2e0] ss:$16 sps:$4 sm:$0xff]  }
  0x57   :  { %4160 = vmatprep.subr.msk.bf16.mxu0 %vm168_vm0, %v4157_v3  ;;  %4162 = vmatprep.subr.msk.bf16.mxu1 %vm168_vm0, %v4159_v4  ;;  %v170_v9 = vsel %vm168_vm0, %v4156_v5, 0  ;;  %v4700_v14 = vld [vmem:[#allocation8 + $0xc4] ss:$16 sps:$4 sm:$0xff]   ;;  %v4698_v16 = vld [vmem:[#allocation8 + $0xc0] ss:$16 sps:$4 sm:$0xff]  }
  0x58   :  { %v176_v10 = vsel %vm168_vm0, %v4158_v6, 0  ;;  %196 = vmatpush1.bf16.msra.mxu0 %v170_v9  ;;  %v4703_v15 = vld [vmem:[#allocation8 + $0x2c4] ss:$16 sps:$4 sm:$0xff]   ;;  %v4701_v17 = vld [vmem:[#allocation8 + $0x2c0] ss:$16 sps:$4 sm:$0xff]  }
  0x59   :  { %237 = vmatpush1.bf16.msra.mxu1 %v176_v10  ;;  %1061 = vmatprep.subr.bf16.mxu0 %v4694_v8  ;;  %v4706_v18 = vld [vmem:[#allocation8 + $0xa4] ss:$16 sps:$4 sm:$0xff]   ;;  %v4704_v20 = vld [vmem:[#allocation8 + $0xa0] ss:$16 sps:$4 sm:$0xff]   ;;  %v4790_v10 = vld [vmem:[#allocation8 + $0xec] ss:$16 sps:$4 sm:$0xff]  }
  0x5a   :  { %1102 = vmatprep.subr.bf16.mxu1 %v4697_v12  ;;  %v4709_v19 = vld [vmem:[#allocation8 + $0x2a4] ss:$16 sps:$4 sm:$0xff]   ;;  %v4707_v21 = vld [vmem:[#allocation8 + $0x2a0] ss:$16 sps:$4 sm:$0xff]   ;;  %v134_v12 = vlaneseq }
  0x5b   :  { %4161 = vmatmul.mubr.msk.bf16.vlgmr.msra.gmra.mxu0 %vm164_vm1, %v129_v7  ;;  %v4712_v22 = vld [vmem:[#allocation8 + $0x84] ss:$16 sps:$4 sm:$0xff]   ;;  %v4710_v24 = vld [vmem:[#allocation8 + $0x80] ss:$16 sps:$4 sm:$0xff]  }
  0x5c   :  { %4163 = vmatmul.mubr.msk.bf16.vlgmr.msra.gmra.mxu1 %vm164_vm1, %v129_v7  ;;  %1062 = vmatpush1.bf16.msra.mxu0 %v4692_v11  ;;  %v4715_v23 = vld [vmem:[#allocation8 + $0x284] ss:$16 sps:$4 sm:$0xff]   ;;  %v4713_v25 = vld [vmem:[#allocation8 + $0x280] ss:$16 sps:$4 sm:$0xff]   ;;  %v4793_v11 = vld [vmem:[#allocation8 + $0x2ec] ss:$16 sps:$4 sm:$0xff]  }
  0x5d   :  { %1103 = vmatpush1.bf16.msra.mxu1 %v4695_v13  ;;  %1063 = vmatprep.subr.bf16.mxu0 %v4700_v14  ;;  %v4718_v26 = vld [vmem:[#allocation8 + $0x64] ss:$16 sps:$4 sm:$0xff]   ;;  %v4716_v28 = vld [vmem:[#allocation8 + $0x60] ss:$16 sps:$4 sm:$0xff]   ;;  %v5735_v13 = vshrl.u32 %v134_v12, 7 }
  0x5e   :  { %1104 = vmatprep.subr.bf16.mxu1 %v4703_v15  ;;  %v4721_v27 = vld [vmem:[#allocation8 + $0x264] ss:$16 sps:$4 sm:$0xff]   ;;  %v4719_v29 = vld [vmem:[#allocation8 + $0x260] ss:$16 sps:$4 sm:$0xff]   ;;  %v132_v14 = vld [vmem:[#allocation7] sm:$0xf] }
  0x5f   :  { %v4724_v30 = vld [vmem:[#allocation8 + $0x44] ss:$16 sps:$4 sm:$0xff]   ;;  %v4722_v32 = vld [vmem:[#allocation8 + $0x40] ss:$16 sps:$4 sm:$0xff]   ;;  %v5738_v15 = vsub.s32 0, %v5735_v13 }
  0x60   :  { %1064 = vmatpush1.bf16.msra.mxu0 %v4698_v16  ;;  %v4727_v31 = vld [vmem:[#allocation8 + $0x244] ss:$16 sps:$4 sm:$0xff]   ;;  %v4725_v33 = vld [vmem:[#allocation8 + $0x240] ss:$16 sps:$4 sm:$0xff]   ;;  %v5741_v16 = vsub.s32 2, %v5735_v13 }
  0x61   :  { %1105 = vmatpush1.bf16.msra.mxu1 %v4701_v17  ;;  %1065 = vmatprep.subr.bf16.mxu0 %v4706_v18  ;;  %v4730_v34 = vld [vmem:[#allocation8 + $0x24] ss:$16 sps:$4 sm:$0xff]   ;;  %v4728_v36 = vld [vmem:[#allocation8 + $0x20] ss:$16 sps:$4 sm:$0xff]   ;;  %v5744_v17 = vsub.s32 1, %v5735_v13  ;;  %v5747_v18 = vsub.s32 3, %v5735_v13 }
  0x62   :  { %1106 = vmatprep.subr.bf16.mxu1 %v4709_v19  ;;  %v4733_v35 = vld [vmem:[#allocation8 + $0x224] ss:$16 sps:$4 sm:$0xff]   ;;  %v4731_v37 = vld [vmem:[#allocation8 + $0x220] ss:$16 sps:$4 sm:$0xff]   ;;  %v137_v19 = vrot.slane %v132_v14, %v5738_v15  ;;  %v4839_v12 = vld [vmem:[#allocation8 + $0x3e8] ss:$16 sps:$4 sm:$0xff]  }
  0x63   :  { %v4736_v38 = vld [vmem:[#allocation8 + $0x4] ss:$16 sps:$4 sm:$0xff]   ;;  %v4734_v40 = vld [vmem:[#allocation8] ss:$16 sps:$4 sm:$0xff]  }
  0x64   :  { %1066 = vmatpush1.bf16.msra.mxu0 %v4704_v20  ;;  %v4739_v39 = vld [vmem:[#allocation8 + $0x204] ss:$16 sps:$4 sm:$0xff]   ;;  %v4737_v41 = vld [vmem:[#allocation8 + $0x200] ss:$16 sps:$4 sm:$0xff]   ;;  %v145_v20 = vrot.slane %v132_v14, %v5741_v16 }
  0x65   :  { %1107 = vmatpush1.bf16.msra.mxu1 %v4707_v21  ;;  %1067 = vmatprep.subr.bf16.mxu0 %v4712_v22  ;;  %v4742_v42 = vld [vmem:[#allocation8 + $0x1e4] ss:$16 sps:$4 sm:$0xff]   ;;  %v4740_v44 = vld [vmem:[#allocation8 + $0x1e0] ss:$16 sps:$4 sm:$0xff]   ;;  %v141_v21 = vrot.slane %v132_v14, %v5744_v17  ;;  %v149_v22 = vrot.slane %v132_v14, %v5747_v18  ;;  %v4844_v14 = vld [vmem:[#allocation8 + $0x1cc] ss:$16 sps:$4 sm:$0xff]  }
  0x66   :  { %1108 = vmatprep.subr.bf16.mxu1 %v4715_v23  ;;  %v4745_v43 = vld [vmem:[#allocation8 + $0x3e4] ss:$16 sps:$4 sm:$0xff]   ;;  %v4743_v45 = vld [vmem:[#allocation8 + $0x3e0] ss:$16 sps:$4 sm:$0xff]  }
  0x67   :  { %v4748_v46 = vld [vmem:[#allocation8 + $0x1c4] ss:$16 sps:$4 sm:$0xff]   ;;  %v4746_v48 = vld [vmem:[#allocation8 + $0x1c0] ss:$16 sps:$4 sm:$0xff]  }
  0x68   :  { %1068 = vmatpush1.bf16.msra.mxu0 %v4710_v24  ;;  %v4751_v47 = vld [vmem:[#allocation8 + $0x3c4] ss:$16 sps:$4 sm:$0xff]   ;;  %v4749_v49 = vld [vmem:[#allocation8 + $0x3c0] ss:$16 sps:$4 sm:$0xff]  }
  0x69   :  { %1109 = vmatpush1.bf16.msra.mxu1 %v4713_v25  ;;  %1069 = vmatprep.subr.bf16.mxu0 %v4718_v26  ;;  %v4754_v50 = vld [vmem:[#allocation8 + $0x1a4] ss:$16 sps:$4 sm:$0xff]   ;;  %v4752_v52 = vld [vmem:[#allocation8 + $0x1a0] ss:$16 sps:$4 sm:$0xff]  }
  0x6a   :  { %1110 = vmatprep.subr.bf16.mxu1 %v4721_v27  ;;  %v4757_v51 = vld [vmem:[#allocation8 + $0x3a4] ss:$16 sps:$4 sm:$0xff]   ;;  %v4755_v53 = vld [vmem:[#allocation8 + $0x3a0] ss:$16 sps:$4 sm:$0xff]  }
  0x6b   :  { %v4760_v54 = vld [vmem:[#allocation8 + $0x184] ss:$16 sps:$4 sm:$0xff]   ;;  %v4758_v56 = vld [vmem:[#allocation8 + $0x180] ss:$16 sps:$4 sm:$0xff]  }
  0x6c   :  { %1070 = vmatpush1.bf16.msra.mxu0 %v4716_v28  ;;  %v4763_v55 = vld [vmem:[#allocation8 + $0x384] ss:$16 sps:$4 sm:$0xff]   ;;  %v4761_v57 = vld [vmem:[#allocation8 + $0x380] ss:$16 sps:$4 sm:$0xff]  }
  0x6d   :  { %1111 = vmatpush1.bf16.msra.mxu1 %v4719_v29  ;;  %1071 = vmatprep.subr.bf16.mxu0 %v4724_v30  ;;  %v4766_v58 = vld [vmem:[#allocation8 + $0x164] ss:$16 sps:$4 sm:$0xff]   ;;  %v4764_v60 = vld [vmem:[#allocation8 + $0x160] ss:$16 sps:$4 sm:$0xff]  }
  0x6e   :  { %1112 = vmatprep.subr.bf16.mxu1 %v4727_v31  ;;  %v4769_v59 = vld [vmem:[#allocation8 + $0x364] ss:$16 sps:$4 sm:$0xff]   ;;  %v4767_v61 = vld [vmem:[#allocation8 + $0x360] ss:$16 sps:$4 sm:$0xff]  }
  0x6f   :  { %v4772_v62 = vld [vmem:[#allocation8 + $0x144] ss:$16 sps:$4 sm:$0xff]   ;;  %v4770_v0 = vld [vmem:[#allocation8 + $0x140] ss:$16 sps:$4 sm:$0xff]  }
  0x70   :  { %1072 = vmatpush1.bf16.msra.mxu0 %v4722_v32  ;;  %v4775_v63 = vld [vmem:[#allocation8 + $0x344] ss:$16 sps:$4 sm:$0xff]   ;;  %v4773_v1 = vld [vmem:[#allocation8 + $0x340] ss:$16 sps:$4 sm:$0xff]  }
  0x71   :  { %1113 = vmatpush1.bf16.msra.mxu1 %v4725_v33  ;;  %1073 = vmatprep.subr.bf16.mxu0 %v4730_v34  ;;  %v4778_v2 = vld [vmem:[#allocation8 + $0x124] ss:$16 sps:$4 sm:$0xff]   ;;  %v4776_v4 = vld [vmem:[#allocation8 + $0x120] ss:$16 sps:$4 sm:$0xff]  }
  0x72   :  { %1114 = vmatprep.subr.bf16.mxu1 %v4733_v35  ;;  %v4781_v3 = vld [vmem:[#allocation8 + $0x324] ss:$16 sps:$4 sm:$0xff]   ;;  %v4779_v5 = vld [vmem:[#allocation8 + $0x320] ss:$16 sps:$4 sm:$0xff]  }
  0x73   :  { %v4784_v6 = vld [vmem:[#allocation8 + $0x104] ss:$16 sps:$4 sm:$0xff]   ;;  %v4782_v8 = vld [vmem:[#allocation8 + $0x100] ss:$16 sps:$4 sm:$0xff]  }
  0x74   :  { %1074 = vmatpush1.bf16.msra.mxu0 %v4728_v36  ;;  %v4787_v7 = vld [vmem:[#allocation8 + $0x304] ss:$16 sps:$4 sm:$0xff]   ;;  %v4785_v9 = vld [vmem:[#allocation8 + $0x300] ss:$16 sps:$4 sm:$0xff]  }
  0x75   :  { %1115 = vmatpush1.bf16.msra.mxu1 %v4731_v37  ;;  %1075 = vmatprep.subr.bf16.mxu0 %v4736_v38  ;;  %v4788_v37 = vld [vmem:[#allocation8 + $0xe8] ss:$16 sps:$4 sm:$0xff]  }
  0x76   :  { %1116 = vmatprep.subr.bf16.mxu1 %v4739_v39  ;;  %v4791_v38 = vld [vmem:[#allocation8 + $0x2e8] ss:$16 sps:$4 sm:$0xff]  }
  0x78   :  { %1076 = vmatpush1.bf16.msra.mxu0 %v4734_v40 }
  0x79   :  { %1117 = vmatpush1.bf16.msra.mxu1 %v4737_v41  ;;  %1077 = vmatprep.subr.bf16.mxu0 %v4742_v42 }
  0x7a   :  { %1118 = vmatprep.subr.bf16.mxu1 %v4745_v43 }
  0x7c   :  { %1078 = vmatpush2.bf16.msra.mxu0 %v4740_v44  ;;  %v4796_v44 = vld [vmem:[#allocation8 + $0xcc] ss:$16 sps:$4 sm:$0xff]  }
  0x7d   :  { %1119 = vmatpush2.bf16.msra.mxu1 %v4743_v45  ;;  %1079 = vmatprep.subr.bf16.mxu0 %v4748_v46  ;;  %v4799_v45 = vld [vmem:[#allocation8 + $0x2cc] ss:$16 sps:$4 sm:$0xff]  }
  0x7e   :  { %1120 = vmatprep.subr.bf16.mxu1 %v4751_v47  ;;  %v4794_v47 = vld [vmem:[#allocation8 + $0xc8] ss:$16 sps:$4 sm:$0xff]  }
  0x80   :  { %1080 = vmatpush2.bf16.msra.mxu0 %v4746_v48  ;;  %v4797_v48 = vld [vmem:[#allocation8 + $0x2c8] ss:$16 sps:$4 sm:$0xff]  }
  0x81   :  { %1121 = vmatpush2.bf16.msra.mxu1 %v4749_v49  ;;  %1081 = vmatprep.subr.bf16.mxu0 %v4754_v50  ;;  %v4802_v49 = vld [vmem:[#allocation8 + $0xac] ss:$16 sps:$4 sm:$0xff]  }
  0x82   :  { %1122 = vmatprep.subr.bf16.mxu1 %v4757_v51  ;;  %v4805_v50 = vld [vmem:[#allocation8 + $0x2ac] ss:$16 sps:$4 sm:$0xff]   ;;  %v4800_v51 = vld [vmem:[#allocation8 + $0xa8] ss:$16 sps:$4 sm:$0xff]  }
  0x84   :  { %1082 = vmatpush2.bf16.msra.mxu0 %v4752_v52  ;;  %v4803_v52 = vld [vmem:[#allocation8 + $0x2a8] ss:$16 sps:$4 sm:$0xff]  }
  0x85   :  { %1123 = vmatpush2.bf16.msra.mxu1 %v4755_v53  ;;  %1083 = vmatprep.subr.bf16.mxu0 %v4760_v54  ;;  %v4808_v53 = vld [vmem:[#allocation8 + $0x8c] ss:$16 sps:$4 sm:$0xff]  }
  0x86   :  { %1124 = vmatprep.subr.bf16.mxu1 %v4763_v55  ;;  %v4811_v54 = vld [vmem:[#allocation8 + $0x28c] ss:$16 sps:$4 sm:$0xff]   ;;  %v4806_v55 = vld [vmem:[#allocation8 + $0x88] ss:$16 sps:$4 sm:$0xff]  }
  0x88   :  { %1084 = vmatpush2.bf16.msra.mxu0 %v4758_v56  ;;  %v4809_v56 = vld [vmem:[#allocation8 + $0x288] ss:$16 sps:$4 sm:$0xff]  }
  0x89   :  { %1125 = vmatpush2.bf16.msra.mxu1 %v4761_v57  ;;  %1085 = vmatprep.subr.bf16.mxu0 %v4766_v58  ;;  %v4814_v57 = vld [vmem:[#allocation8 + $0x6c] ss:$16 sps:$4 sm:$0xff]  }
  0x8a   :  { %1126 = vmatprep.subr.bf16.mxu1 %v4769_v59  ;;  %v4817_v58 = vld [vmem:[#allocation8 + $0x26c] ss:$16 sps:$4 sm:$0xff]   ;;  %v4812_v59 = vld [vmem:[#allocation8 + $0x68] ss:$16 sps:$4 sm:$0xff]  }
  0x8c   :  { %1086 = vmatpush2.bf16.msra.mxu0 %v4764_v60  ;;  %v4815_v60 = vld [vmem:[#allocation8 + $0x268] ss:$16 sps:$4 sm:$0xff]  }
  0x8d   :  { %1127 = vmatpush2.bf16.msra.mxu1 %v4767_v61  ;;  %1087 = vmatprep.subr.bf16.mxu0 %v4772_v62  ;;  %v4820_v61 = vld [vmem:[#allocation8 + $0x4c] ss:$16 sps:$4 sm:$0xff]  }
  0x8e   :  { %1128 = vmatprep.subr.bf16.mxu1 %v4775_v63  ;;  %v4823_v62 = vld [vmem:[#allocation8 + $0x24c] ss:$16 sps:$4 sm:$0xff]   ;;  %v4818_v63 = vld [vmem:[#allocation8 + $0x48] ss:$16 sps:$4 sm:$0xff]  }
  0x90   :  { %1088 = vmatpush2.bf16.msra.mxu0 %v4770_v0  ;;  %v4821_v0 = vld [vmem:[#allocation8 + $0x248] ss:$16 sps:$4 sm:$0xff]  }
  0x91   :  { %1129 = vmatpush2.bf16.msra.mxu1 %v4773_v1  ;;  %1089 = vmatprep.subr.bf16.mxu0 %v4778_v2  ;;  %v4826_v1 = vld [vmem:[#allocation8 + $0x2c] ss:$16 sps:$4 sm:$0xff]  }
  0x92   :  { %1130 = vmatprep.subr.bf16.mxu1 %v4781_v3  ;;  %v4829_v2 = vld [vmem:[#allocation8 + $0x22c] ss:$16 sps:$4 sm:$0xff]   ;;  %v4824_v3 = vld [vmem:[#allocation8 + $0x28] ss:$16 sps:$4 sm:$0xff]  }
  0x94   :  { %1090 = vmatpush2.bf16.msra.mxu0 %v4776_v4  ;;  %v4827_v4 = vld [vmem:[#allocation8 + $0x228] ss:$16 sps:$4 sm:$0xff]  }
  0x95   :  { %1131 = vmatpush2.bf16.msra.mxu1 %v4779_v5  ;;  %1091 = vmatprep.subr.bf16.mxu0 %v4784_v6  ;;  %v4832_v5 = vld [vmem:[#allocation8 + $0xc] ss:$16 sps:$4 sm:$0xff]  }
  0x96   :  { %1132 = vmatprep.subr.bf16.mxu1 %v4787_v7  ;;  %v4835_v6 = vld [vmem:[#allocation8 + $0x20c] ss:$16 sps:$4 sm:$0xff]   ;;  %v4830_v7 = vld [vmem:[#allocation8 + $0x8] ss:$16 sps:$4 sm:$0xff]  }
  0x98   :  { %1092 = vmatpush2.bf16.msra.mxu0 %v4782_v8  ;;  %v4833_v8 = vld [vmem:[#allocation8 + $0x208] ss:$16 sps:$4 sm:$0xff]  }
  0x99   :  { %1133 = vmatpush2.bf16.msra.mxu1 %v4785_v9  ;;  %1143 = vmatprep.subr.bf16.mxu0 %v4790_v10  ;;  %v4838_v9 = vld [vmem:[#allocation8 + $0x1ec] ss:$16 sps:$4 sm:$0xff]  }
  0x9a   :  { %1184 = vmatprep.subr.bf16.mxu1 %v4793_v11  ;;  %v4841_v10 = vld [vmem:[#allocation8 + $0x3ec] ss:$16 sps:$4 sm:$0xff]   ;;  %v4836_v11 = vld [vmem:[#allocation8 + $0x1e8] ss:$16 sps:$4 sm:$0xff]  }
 0x11b   :  { %v215_v23 = vpop.f32.mrf.mxu0 }
 0x11c   :  { %v256_v24 = vpop.f32.mrf.mxu1  ;;  %v216_v25 = vadd.f32 %v215_v23, %v137_v19  ;;  %v4847_v19 = vld [vmem:[#allocation8 + $0x3cc] ss:$16 sps:$4 sm:$0xff]  }
 0x11d   :  { %v257_v26 = vadd.f32 %v256_v24, %v145_v20  ;;  %v217_v27 = vpop.f32.mrf.mxu0  ;;  %v4842_v20 = vld [vmem:[#allocation8 + $0x1c8] ss:$16 sps:$4 sm:$0xff]   ;;  %v4853_v23 = vld [vmem:[#allocation8 + $0x3ac] ss:$16 sps:$4 sm:$0xff]  }
 0x11e   :  { %v258_v28 = vpop.f32.mrf.mxu1  ;;  %v218_v30 = vadd.f32 %v217_v27, %v141_v21  ;;  %v263_v32 = vmax.f32 %v216_v25, 0.0  ;;  %v4845_v21 = vld [vmem:[#allocation8 + $0x3c8] ss:$16 sps:$4 sm:$0xff]   ;;  %v4859_v27 = vld [vmem:[#allocation8 + $0x38c] ss:$16 sps:$4 sm:$0xff]  }
 0x11f   :  { %v265_v29 = vmax.f32 %v257_v26, 0.0  ;;  %v259_v31 = vadd.f32 %v258_v28, %v149_v22  ;;  %v219_v33 = vpop.f32.mrf.mxu0  ;;  %v4850_v22 = vld [vmem:[#allocation8 + $0x1ac] ss:$16 sps:$4 sm:$0xff]   ;;  %v4848_v24 = vld [vmem:[#allocation8 + $0x1a8] ss:$16 sps:$4 sm:$0xff]  }
 0x120   :  { %v260_v34 = vpop.f32.mrf.mxu1  ;;  %v264_v35 = vmax.f32 %v218_v30, 0.0  ;;  %v5755_v46 = vpack.c.bf16 %v263_v32, %v263_v32  ;;  %v4851_v25 = vld [vmem:[#allocation8 + $0x3a8] ss:$16 sps:$4 sm:$0xff]   ;;  %v4856_v26 = vld [vmem:[#allocation8 + $0x18c] ss:$16 sps:$4 sm:$0xff]  }
 0x121   :  { %v266_v36 = vmax.f32 %v259_v31, 0.0  ;;  %v5753_v39 = vpack.c.bf16 %v265_v29, %v265_v29  ;;  %v220_v40 = vpop.f32.mrf.mxu0  ;;  %v4854_v28 = vld [vmem:[#allocation8 + $0x188] ss:$16 sps:$4 sm:$0xff]   ;;  %v4862_v30 = vld [vmem:[#allocation8 + $0x16c] ss:$16 sps:$4 sm:$0xff]  }
 0x122   :  { %v261_v41 = vpop.f32.mrf.mxu1  ;;  %v268_v42 = vpack.c.bf16 %v264_v35, %v264_v35  ;;  %v4857_v29 = vld [vmem:[#allocation8 + $0x388] ss:$16 sps:$4 sm:$0xff]   ;;  %v4865_v31 = vld [vmem:[#allocation8 + $0x36c] ss:$16 sps:$4 sm:$0xff]  }
 0x123   :  { %v270_v43 = vpack.c.bf16 %v266_v36, %v266_v36  ;;  %v4860_v32 = vld [vmem:[#allocation8 + $0x168] ss:$16 sps:$4 sm:$0xff]   ;;  %v4868_v34 = vld [vmem:[#allocation8 + $0x14c] ss:$16 sps:$4 sm:$0xff]  }
 0x124   :  { %1093 = vmatprep.mubr.bf16.mxu0 %v268_v42  ;;  %v4863_v33 = vld [vmem:[#allocation8 + $0x368] ss:$16 sps:$4 sm:$0xff]   ;;  %v4871_v35 = vld [vmem:[#allocation8 + $0x34c] ss:$16 sps:$4 sm:$0xff]  }
 0x125   :  { %1134 = vmatprep.mubr.bf16.mxu1 %v270_v43  ;;  %1094 = vmatmul.mubr.bf16.vlgmr.msra.gmra.mxu0 %v5755_v46  ;;  %v4866_v36 = vld [vmem:[#allocation8 + $0x148] ss:$16 sps:$4 sm:$0xff]   ;;  %v4877_v40 = vld [vmem:[#allocation8 + $0x32c] ss:$16 sps:$4 sm:$0xff]  }
 0x126   :  { %1135 = vmatmul.mubr.bf16.vlgmr.msra.gmra.mxu1 %v5753_v39  ;;  %1144 = vmatpush1.bf16.msra.mxu0 %v4788_v37  ;;  %v4869_v37 = vld [vmem:[#allocation8 + $0x348] ss:$16 sps:$4 sm:$0xff]  }
 0x127   :  { %1185 = vmatpush1.bf16.msra.mxu1 %v4791_v38  ;;  %1175 = vmatprep.mubr.bf16.mxu0 %v268_v42  ;;  %v4874_v38 = vld [vmem:[#allocation8 + $0x12c] ss:$16 sps:$4 sm:$0xff]   ;;  %v4872_v41 = vld [vmem:[#allocation8 + $0x128] ss:$16 sps:$4 sm:$0xff]  }
 0x128   :  { %1216 = vmatprep.mubr.bf16.mxu1 %v270_v43  ;;  %1145 = vmatprep.subr.bf16.mxu0 %v4796_v44  ;;  %v4875_v42 = vld [vmem:[#allocation8 + $0x328] ss:$16 sps:$4 sm:$0xff]   ;;  %v4880_v43 = vld [vmem:[#allocation8 + $0x10c] ss:$16 sps:$4 sm:$0xff]  }
 0x129   :  { %1186 = vmatprep.subr.bf16.mxu1 %v4799_v45  ;;  %v4883_v44 = vld [vmem:[#allocation8 + $0x30c] ss:$16 sps:$4 sm:$0xff]   ;;  %v4878_v45 = vld [vmem:[#allocation8 + $0x108] ss:$16 sps:$4 sm:$0xff]  }
 0x12a   :  { %1146 = vmatpush1.bf16.msra.mxu0 %v4794_v47  ;;  %v4881_v47 = vld [vmem:[#allocation8 + $0x308] ss:$16 sps:$4 sm:$0xff]  }
 0x12b   :  { %1187 = vmatpush1.bf16.msra.mxu1 %v4797_v48  ;;  %1147 = vmatprep.subr.bf16.mxu0 %v4802_v49  ;;  %v4886_v48 = vld [vmem:[#allocation10 + $0xe4] ss:$16 sps:$4 sm:$0xff]   ;;  %v4884_v49 = vld [vmem:[#allocation10 + $0xe0] ss:$16 sps:$4 sm:$0xff]  }
 0x12c   :  { %1188 = vmatprep.subr.bf16.mxu1 %v4805_v50  ;;  %v4889_v50 = vld [vmem:[#allocation10 + $0xc4] ss:$16 sps:$4 sm:$0xff]  }
 0x12e   :  { %1148 = vmatpush1.bf16.msra.mxu0 %v4800_v51  ;;  %v4887_v51 = vld [vmem:[#allocation10 + $0xc0] ss:$16 sps:$4 sm:$0xff]  }
 0x12f   :  { %1189 = vmatpush1.bf16.msra.mxu1 %v4803_v52  ;;  %1149 = vmatprep.subr.bf16.mxu0 %v4808_v53  ;;  %v4892_v52 = vld [vmem:[#allocation10 + $0xa4] ss:$16 sps:$4 sm:$0xff]   ;;  %v4890_v53 = vld [vmem:[#allocation10 + $0xa0] ss:$16 sps:$4 sm:$0xff]  }
 0x130   :  { %1190 = vmatprep.subr.bf16.mxu1 %v4811_v54  ;;  %v4895_v54 = vld [vmem:[#allocation10 + $0x84] ss:$16 sps:$4 sm:$0xff]  }
 0x132   :  { %1150 = vmatpush1.bf16.msra.mxu0 %v4806_v55  ;;  %v4893_v55 = vld [vmem:[#allocation10 + $0x80] ss:$16 sps:$4 sm:$0xff]  }
 0x133   :  { %1191 = vmatpush1.bf16.msra.mxu1 %v4809_v56  ;;  %1151 = vmatprep.subr.bf16.mxu0 %v4814_v57  ;;  %v4932_v56 = vld [vmem:[#allocation10 + $0x2e0] ss:$16 sps:$4 sm:$0xff]   ;;  %v4934_v57 = vld [vmem:[#allocation10 + $0x2e4] ss:$16 sps:$4 sm:$0xff]  }
 0x134   :  { %1192 = vmatprep.subr.bf16.mxu1 %v4817_v58  ;;  %v4898_v58 = vld [vmem:[#allocation10 + $0x64] ss:$16 sps:$4 sm:$0xff]  }
 0x136   :  { %1152 = vmatpush1.bf16.msra.mxu0 %v4812_v59  ;;  %v4938_v59 = vld [vmem:[#allocation10 + $0x2c0] ss:$16 sps:$4 sm:$0xff]  }
 0x137   :  { %1193 = vmatpush1.bf16.msra.mxu1 %v4815_v60  ;;  %1153 = vmatprep.subr.bf16.mxu0 %v4820_v61  ;;  %v4901_v60 = vld [vmem:[#allocation10 + $0x44] ss:$16 sps:$4 sm:$0xff]   ;;  %v4899_v61 = vld [vmem:[#allocation10 + $0x40] ss:$16 sps:$4 sm:$0xff]  }
 0x138   :  { %1194 = vmatprep.subr.bf16.mxu1 %v4823_v62  ;;  %v4944_v62 = vld [vmem:[#allocation10 + $0x2a0] ss:$16 sps:$4 sm:$0xff]  }
 0x13a   :  { %1154 = vmatpush1.bf16.msra.mxu0 %v4818_v63  ;;  %v4946_v63 = vld [vmem:[#allocation10 + $0x2a4] ss:$16 sps:$4 sm:$0xff]  }
 0x13b   :  { %1195 = vmatpush1.bf16.msra.mxu1 %v4821_v0  ;;  %1155 = vmatprep.subr.bf16.mxu0 %v4826_v1  ;;  %v4904_v0 = vld [vmem:[#allocation10 + $0x24] ss:$16 sps:$4 sm:$0xff]   ;;  %v4902_v1 = vld [vmem:[#allocation10 + $0x20] ss:$16 sps:$4 sm:$0xff]  }
 0x13c   :  { %1196 = vmatprep.subr.bf16.mxu1 %v4829_v2  ;;  %v4950_v2 = vld [vmem:[#allocation10 + $0x280] ss:$16 sps:$4 sm:$0xff]  }
 0x13e   :  { %1156 = vmatpush1.bf16.msra.mxu0 %v4824_v3  ;;  %v4952_v3 = vld [vmem:[#allocation10 + $0x284] ss:$16 sps:$4 sm:$0xff]  }
 0x13f   :  { %1197 = vmatpush1.bf16.msra.mxu1 %v4827_v4  ;;  %1157 = vmatprep.subr.bf16.mxu0 %v4832_v5  ;;  %v4907_v4 = vld [vmem:[#allocation10 + $0x4] ss:$16 sps:$4 sm:$0xff]   ;;  %v4905_v5 = vld [vmem:[#allocation10] ss:$16 sps:$4 sm:$0xff]  }
 0x140   :  { %1198 = vmatprep.subr.bf16.mxu1 %v4835_v6  ;;  %v4956_v6 = vld [vmem:[#allocation10 + $0x260] ss:$16 sps:$4 sm:$0xff]  }
 0x142   :  { %1158 = vmatpush1.bf16.msra.mxu0 %v4830_v7  ;;  %v4958_v7 = vld [vmem:[#allocation10 + $0x264] ss:$16 sps:$4 sm:$0xff]  }
 0x143   :  { %1199 = vmatpush1.bf16.msra.mxu1 %v4833_v8  ;;  %1159 = vmatprep.subr.bf16.mxu0 %v4838_v9  ;;  %v4910_v8 = vld [vmem:[#allocation10 + $0x1e4] ss:$16 sps:$4 sm:$0xff]   ;;  %v4908_v9 = vld [vmem:[#allocation10 + $0x1e0] ss:$16 sps:$4 sm:$0xff]  }
 0x144   :  { %1200 = vmatprep.subr.bf16.mxu1 %v4841_v10  ;;  %v4962_v10 = vld [vmem:[#allocation10 + $0x240] ss:$16 sps:$4 sm:$0xff]  }
 0x146   :  { %1160 = vmatpush2.bf16.msra.mxu0 %v4836_v11  ;;  %v4964_v11 = vld [vmem:[#allocation10 + $0x244] ss:$16 sps:$4 sm:$0xff]  }
 0x147   :  { %1201 = vmatpush2.bf16.msra.mxu1 %v4839_v12  ;;  %1161 = vmatprep.subr.bf16.mxu0 %v4844_v14  ;;  %v4913_v12 = vld [vmem:[#allocation10 + $0x1c4] ss:$16 sps:$4 sm:$0xff]   ;;  %v4911_v14 = vld [vmem:[#allocation10 + $0x1c0] ss:$16 sps:$4 sm:$0xff]  }
 0x148   :  { %1202 = vmatprep.subr.bf16.mxu1 %v4847_v19  ;;  %v4968_v19 = vld [vmem:[#allocation10 + $0x220] ss:$16 sps:$4 sm:$0xff]  }
 0x14a   :  { %1162 = vmatpush2.bf16.msra.mxu0 %v4842_v20  ;;  %v4970_v20 = vld [vmem:[#allocation10 + $0x224] ss:$16 sps:$4 sm:$0xff]  }
 0x14b   :  { %1203 = vmatpush2.bf16.msra.mxu1 %v4845_v21  ;;  %1163 = vmatprep.subr.bf16.mxu0 %v4850_v22  ;;  %v4916_v21 = vld [vmem:[#allocation10 + $0x1a4] ss:$16 sps:$4 sm:$0xff]   ;;  %v4914_v22 = vld [vmem:[#allocation10 + $0x1a0] ss:$16 sps:$4 sm:$0xff]  }
 0x14c   :  { %1204 = vmatprep.subr.bf16.mxu1 %v4853_v23  ;;  %v4974_v23 = vld [vmem:[#allocation10 + $0x200] ss:$16 sps:$4 sm:$0xff]  }
 0x14e   :  { %1164 = vmatpush2.bf16.msra.mxu0 %v4848_v24  ;;  %v4976_v24 = vld [vmem:[#allocation10 + $0x204] ss:$16 sps:$4 sm:$0xff]  }
 0x14f   :  { %1205 = vmatpush2.bf16.msra.mxu1 %v4851_v25  ;;  %1165 = vmatprep.subr.bf16.mxu0 %v4856_v26  ;;  %v4919_v25 = vld [vmem:[#allocation10 + $0x184] ss:$16 sps:$4 sm:$0xff]   ;;  %v4917_v26 = vld [vmem:[#allocation10 + $0x180] ss:$16 sps:$4 sm:$0xff]  }
 0x150   :  { %1206 = vmatprep.subr.bf16.mxu1 %v4859_v27  ;;  %v4980_v27 = vld [vmem:[#allocation10 + $0x3e0] ss:$16 sps:$4 sm:$0xff]  }
 0x152   :  { %1166 = vmatpush2.bf16.msra.mxu0 %v4854_v28  ;;  %v4982_v28 = vld [vmem:[#allocation10 + $0x3e4] ss:$16 sps:$4 sm:$0xff]  }
 0x153   :  { %1207 = vmatpush2.bf16.msra.mxu1 %v4857_v29  ;;  %1167 = vmatprep.subr.bf16.mxu0 %v4862_v30  ;;  %v4922_v29 = vld [vmem:[#allocation10 + $0x164] ss:$16 sps:$4 sm:$0xff]   ;;  %v4920_v30 = vld [vmem:[#allocation10 + $0x160] ss:$16 sps:$4 sm:$0xff]  }
 0x154   :  { %1208 = vmatprep.subr.bf16.mxu1 %v4865_v31  ;;  %v4986_v31 = vld [vmem:[#allocation10 + $0x3c0] ss:$16 sps:$4 sm:$0xff]  }
 0x156   :  { %1168 = vmatpush2.bf16.msra.mxu0 %v4860_v32  ;;  %v4988_v32 = vld [vmem:[#allocation10 + $0x3c4] ss:$16 sps:$4 sm:$0xff]  }
 0x157   :  { %1209 = vmatpush2.bf16.msra.mxu1 %v4863_v33  ;;  %1169 = vmatprep.subr.bf16.mxu0 %v4868_v34  ;;  %v4925_v33 = vld [vmem:[#allocation10 + $0x144] ss:$16 sps:$4 sm:$0xff]   ;;  %v4923_v34 = vld [vmem:[#allocation10 + $0x140] ss:$16 sps:$4 sm:$0xff]  }
 0x158   :  { %1210 = vmatprep.subr.bf16.mxu1 %v4871_v35  ;;  %v4992_v35 = vld [vmem:[#allocation10 + $0x3a0] ss:$16 sps:$4 sm:$0xff]  }
 0x15a   :  { %1170 = vmatpush2.bf16.msra.mxu0 %v4866_v36  ;;  %v4994_v36 = vld [vmem:[#allocation10 + $0x3a4] ss:$16 sps:$4 sm:$0xff]  }
 0x15b   :  { %1211 = vmatpush2.bf16.msra.mxu1 %v4869_v37  ;;  %1171 = vmatprep.subr.bf16.mxu0 %v4874_v38  ;;  %v4928_v37 = vld [vmem:[#allocation10 + $0x124] ss:$16 sps:$4 sm:$0xff]   ;;  %v4926_v38 = vld [vmem:[#allocation10 + $0x120] ss:$16 sps:$4 sm:$0xff]  }
 0x15c   :  { %1212 = vmatprep.subr.bf16.mxu1 %v4877_v40  ;;  %v4998_v40 = vld [vmem:[#allocation10 + $0x380] ss:$16 sps:$4 sm:$0xff]  }
 0x15e   :  { %1172 = vmatpush2.bf16.msra.mxu0 %v4872_v41  ;;  %v5000_v41 = vld [vmem:[#allocation10 + $0x384] ss:$16 sps:$4 sm:$0xff]  }
 0x15f   :  { %1213 = vmatpush2.bf16.msra.mxu1 %v4875_v42  ;;  %1173 = vmatprep.subr.bf16.mxu0 %v4880_v43  ;;  %v4931_v42 = vld [vmem:[#allocation10 + $0x104] ss:$16 sps:$4 sm:$0xff]   ;;  %v4929_v43 = vld [vmem:[#allocation10 + $0x100] ss:$16 sps:$4 sm:$0xff]  }
 0x160   :  { %1214 = vmatprep.subr.bf16.mxu1 %v4883_v44  ;;  %v5004_v44 = vld [vmem:[#allocation10 + $0x360] ss:$16 sps:$4 sm:$0xff]  }
 0x162   :  { %1174 = vmatpush2.bf16.msra.mxu0 %v4878_v45  ;;  %v5006_v45 = vld [vmem:[#allocation10 + $0x364] ss:$16 sps:$4 sm:$0xff]  }
 0x163   :  { %1215 = vmatpush2.bf16.msra.mxu1 %v4881_v47  ;;  %2023 = vmatprep.subr.bf16.mxu0 %v4886_v48  ;;  %v4937_v47 = vld [vmem:[#allocation10 + $0xec] ss:$16 sps:$4 sm:$0xff]   ;;  %v5010_v48 = vld [vmem:[#allocation10 + $0x340] ss:$16 sps:$4 sm:$0xff]  }
 0x164   :  { %2064 = vmatprep.subr.bf16.mxu1 %v4934_v57 }
 0x165   :  { %1176 = vmatmul.mubr.bf16.vlgmr.msra.gmra.mxu0 %v5755_v46  ;;  %v4896_v46 = vld [vmem:[#allocation10 + $0x60] ss:$16 sps:$4 sm:$0xff]  }
 0x166   :  { %1217 = vmatmul.mubr.bf16.vlgmr.msra.gmra.mxu1 %v5753_v39  ;;  %2024 = vmatpush1.bf16.msra.mxu0 %v4884_v49  ;;  %v4940_v39 = vld [vmem:[#allocation10 + $0x2c4] ss:$16 sps:$4 sm:$0xff]  }
 0x167   :  { %2025 = vmatprep.subr.bf16.mxu0 %v4889_v50  ;;  %2065 = vmatpush1.bf16.msra.mxu1 %v4932_v56  ;;  %v5012_v49 = vld [vmem:[#allocation10 + $0x344] ss:$16 sps:$4 sm:$0xff]  }
 0x168   :  { %2066 = vmatprep.subr.bf16.mxu1 %v4940_v39  ;;  %v5018_v50 = vld [vmem:[#allocation10 + $0x324] ss:$16 sps:$4 sm:$0xff]  }
 0x16a   :  { %2026 = vmatpush1.bf16.msra.mxu0 %v4887_v51  ;;  %v5016_v51 = vld [vmem:[#allocation10 + $0x320] ss:$16 sps:$4 sm:$0xff]  }
 0x16b   :  { %2027 = vmatprep.subr.bf16.mxu0 %v4892_v52  ;;  %2067 = vmatpush1.bf16.msra.mxu1 %v4938_v59  ;;  %v5024_v52 = vld [vmem:[#allocation10 + $0x304] ss:$16 sps:$4 sm:$0xff]  }
 0x16c   :  { %2068 = vmatprep.subr.bf16.mxu1 %v4946_v63 }
 0x16e   :  { %2028 = vmatpush1.bf16.msra.mxu0 %v4890_v53  ;;  %v5022_v53 = vld [vmem:[#allocation10 + $0x300] ss:$16 sps:$4 sm:$0xff]  }
 0x16f   :  { %2029 = vmatprep.subr.bf16.mxu0 %v4895_v54  ;;  %2069 = vmatpush1.bf16.msra.mxu1 %v4944_v62  ;;  %v5030_v54 = vld [vmem:[#allocation10 + $0x2ec] ss:$16 sps:$4 sm:$0xff]  }
 0x170   :  { %2070 = vmatprep.subr.bf16.mxu1 %v4952_v3 }
 0x172   :  { %2030 = vmatpush1.bf16.msra.mxu0 %v4893_v55  ;;  %v5764_v55 = vld [vmem:[%s5851_s4] sm:$0xf] }
 0x173   :  { %2031 = vmatprep.subr.bf16.mxu0 %v4898_v58  ;;  %2071 = vmatpush1.bf16.msra.mxu1 %v4950_v2  ;;  %v404_v56 = vrot.slane %v5764_v55, %v5738_v15  ;;  %v408_v57 = vrot.slane %v5764_v55, %v5744_v17 }
 0x174   :  { %2072 = vmatprep.subr.bf16.mxu1 %v4958_v7  ;;  %v4935_v7 = vld [vmem:[#allocation10 + $0xe8] ss:$16 sps:$4 sm:$0xff]  }
 0x176   :  { %2032 = vmatpush1.bf16.msra.mxu0 %v4896_v46 }
 0x177   :  { %2033 = vmatprep.subr.bf16.mxu0 %v4901_v60  ;;  %2073 = vmatpush1.bf16.msra.mxu1 %v4956_v6 }
 0x178   :  { %2074 = vmatprep.subr.bf16.mxu1 %v4964_v11  ;;  %v4949_v11 = vld [vmem:[#allocation10 + $0xac] ss:$16 sps:$4 sm:$0xff]  }
 0x17a   :  { %2034 = vmatpush1.bf16.msra.mxu0 %v4899_v61 }
 0x17b   :  { %2035 = vmatprep.subr.bf16.mxu0 %v4904_v0  ;;  %2075 = vmatpush1.bf16.msra.mxu1 %v4962_v10  ;;  %v4941_v10 = vld [vmem:[#allocation10 + $0xc8] ss:$16 sps:$4 sm:$0xff]  }
 0x17c   :  { %2076 = vmatprep.subr.bf16.mxu1 %v4970_v20  ;;  %v4961_v20 = vld [vmem:[#allocation10 + $0x6c] ss:$16 sps:$4 sm:$0xff]  }
 0x17e   :  { %2036 = vmatpush1.bf16.msra.mxu0 %v4902_v1 }
 0x17f   :  { %2037 = vmatprep.subr.bf16.mxu0 %v4907_v4  ;;  %2077 = vmatpush1.bf16.msra.mxu1 %v4968_v19  ;;  %v4953_v19 = vld [vmem:[#allocation10 + $0x88] ss:$16 sps:$4 sm:$0xff]  }
 0x180   :  { %2078 = vmatprep.subr.bf16.mxu1 %v4976_v24  ;;  %v4973_v24 = vld [vmem:[#allocation10 + $0x2c] ss:$16 sps:$4 sm:$0xff]  }
 0x182   :  { %2038 = vmatpush1.bf16.msra.mxu0 %v4905_v5 }
 0x183   :  { %2039 = vmatprep.subr.bf16.mxu0 %v4910_v8  ;;  %2079 = vmatpush1.bf16.msra.mxu1 %v4974_v23  ;;  %v4965_v23 = vld [vmem:[#allocation10 + $0x48] ss:$16 sps:$4 sm:$0xff]  }
 0x184   :  { %2080 = vmatprep.subr.bf16.mxu1 %v4982_v28  ;;  %v4985_v28 = vld [vmem:[#allocation10 + $0x1ec] ss:$16 sps:$4 sm:$0xff]  }
 0x186   :  { %2040 = vmatpush2.bf16.msra.mxu0 %v4908_v9  ;;  %v4943_v9 = vld [vmem:[#allocation10 + $0xcc] ss:$16 sps:$4 sm:$0xff]  }
 0x187   :  { %2041 = vmatprep.subr.bf16.mxu0 %v4913_v12  ;;  %2081 = vmatpush2.bf16.msra.mxu1 %v4980_v27  ;;  %v4947_v12 = vld [vmem:[#allocation10 + $0xa8] ss:$16 sps:$4 sm:$0xff]  }
 0x188   :  { %2082 = vmatprep.subr.bf16.mxu1 %v4988_v32  ;;  %v4977_v27 = vld [vmem:[#allocation10 + $0x8] ss:$16 sps:$4 sm:$0xff]   ;;  %v4997_v32 = vld [vmem:[#allocation10 + $0x1ac] ss:$16 sps:$4 sm:$0xff]  }
 0x18a   :  { %2042 = vmatpush2.bf16.msra.mxu0 %v4911_v14  ;;  %v4955_v14 = vld [vmem:[#allocation10 + $0x8c] ss:$16 sps:$4 sm:$0xff]  }
 0x18b   :  { %2043 = vmatprep.subr.bf16.mxu0 %v4916_v21  ;;  %2083 = vmatpush2.bf16.msra.mxu1 %v4986_v31  ;;  %v4959_v21 = vld [vmem:[#allocation10 + $0x68] ss:$16 sps:$4 sm:$0xff]  }
 0x18c   :  { %2084 = vmatprep.subr.bf16.mxu1 %v4994_v36  ;;  %v4989_v31 = vld [vmem:[#allocation10 + $0x1c8] ss:$16 sps:$4 sm:$0xff]   ;;  %v5009_v36 = vld [vmem:[#allocation10 + $0x16c] ss:$16 sps:$4 sm:$0xff]  }
 0x18e   :  { %2044 = vmatpush2.bf16.msra.mxu0 %v4914_v22  ;;  %v4967_v22 = vld [vmem:[#allocation10 + $0x4c] ss:$16 sps:$4 sm:$0xff]  }
 0x18f   :  { %2045 = vmatprep.subr.bf16.mxu0 %v4919_v25  ;;  %2085 = vmatpush2.bf16.msra.mxu1 %v4992_v35  ;;  %v4971_v25 = vld [vmem:[#allocation10 + $0x28] ss:$16 sps:$4 sm:$0xff]  }
 0x190   :  { %2086 = vmatprep.subr.bf16.mxu1 %v5000_v41  ;;  %v5001_v35 = vld [vmem:[#allocation10 + $0x188] ss:$16 sps:$4 sm:$0xff]  }
 0x191   :  { %v5013_v41 = vld [vmem:[#allocation10 + $0x148] ss:$16 sps:$4 sm:$0xff]  }
 0x192   :  { %2046 = vmatpush2.bf16.msra.mxu0 %v4917_v26  ;;  %v4979_v26 = vld [vmem:[#allocation10 + $0xc] ss:$16 sps:$4 sm:$0xff]  }
 0x193   :  { %2047 = vmatprep.subr.bf16.mxu0 %v4922_v29  ;;  %2087 = vmatpush2.bf16.msra.mxu1 %v4998_v40  ;;  %v4983_v29 = vld [vmem:[#allocation10 + $0x1e8] ss:$16 sps:$4 sm:$0xff]   ;;  %v412_v40 = vrot.slane %v5764_v55, %v5741_v16 }
 0x194   :  { %2088 = vmatprep.subr.bf16.mxu1 %v5006_v45 }
 0x196   :  { %2048 = vmatpush2.bf16.msra.mxu0 %v4920_v30  ;;  %v4991_v30 = vld [vmem:[#allocation10 + $0x1cc] ss:$16 sps:$4 sm:$0xff]  }
 0x197   :  { %2049 = vmatprep.subr.bf16.mxu0 %v4925_v33  ;;  %2089 = vmatpush2.bf16.msra.mxu1 %v5004_v44  ;;  %v4995_v33 = vld [vmem:[#allocation10 + $0x1a8] ss:$16 sps:$4 sm:$0xff]  }
 0x198   :  { %2090 = vmatprep.subr.bf16.mxu1 %v5012_v49 }
 0x19a   :  { %2050 = vmatpush2.bf16.msra.mxu0 %v4923_v34  ;;  %v5003_v34 = vld [vmem:[#allocation10 + $0x18c] ss:$16 sps:$4 sm:$0xff]  }
 0x19b   :  { %2051 = vmatprep.subr.bf16.mxu0 %v4928_v37  ;;  %2091 = vmatpush2.bf16.msra.mxu1 %v5010_v48  ;;  %v5007_v37 = vld [vmem:[#allocation10 + $0x168] ss:$16 sps:$4 sm:$0xff]  }
 0x19c   :  { %2092 = vmatprep.subr.bf16.mxu1 %v5018_v50  ;;  %v5019_v48 = vld [vmem:[#allocation10 + $0x128] ss:$16 sps:$4 sm:$0xff]  }
 0x19e   :  { %2052 = vmatpush2.bf16.msra.mxu0 %v4926_v38  ;;  %v5015_v38 = vld [vmem:[#allocation10 + $0x14c] ss:$16 sps:$4 sm:$0xff]  }
 0x19f   :  { %2053 = vmatprep.subr.bf16.mxu0 %v4931_v42  ;;  %2093 = vmatpush2.bf16.msra.mxu1 %v5016_v51  ;;  %v5021_v42 = vld [vmem:[#allocation10 + $0x12c] ss:$16 sps:$4 sm:$0xff]  }
 0x1a0   :  { %2094 = vmatprep.subr.bf16.mxu1 %v5024_v52  ;;  %v5027_v51 = vld [vmem:[#allocation10 + $0x10c] ss:$16 sps:$4 sm:$0xff]  }
 0x1a2   :  { %2054 = vmatpush2.bf16.msra.mxu0 %v4929_v43  ;;  %v416_v43 = vrot.slane %v5764_v55, %v5747_v18 }
 0x1a3   :  { %2105 = vmatprep.subr.bf16.mxu0 %v4937_v47  ;;  %2095 = vmatpush2.bf16.msra.mxu1 %v5022_v53 }
 0x1a4   :  { %2146 = vmatprep.subr.bf16.mxu1 %v5030_v54 }
 0x1e5   :  { %v1095_v58 = vpop.f32.mrf.mxu0 }
 0x1e6   :  { %v1136_v46 = vpop.f32.mrf.mxu1  ;;  %v1096_v59 = vadd.f32 %v1095_v58, %v404_v56  ;;  %v5025_v58 = vld [vmem:[#allocation10 + $0x108] ss:$16 sps:$4 sm:$0xff]  }
 0x1e7   :  { %v1097_v39 = vpop.f32.mrf.mxu0 }
 0x1e8   :  { %v1138_v60 = vpop.f32.mrf.mxu1  ;;  %v1137_v61 = vadd.f32 %v1136_v46, %v1096_v59  ;;  %v1098_v62 = vadd.f32 %v1097_v39, %v408_v57 }
 0x1e9   :  { %v1099_v63 = vpop.f32.mrf.mxu0 }
 0x1ea   :  { %v1140_v0 = vpop.f32.mrf.mxu1  ;;  %v1139_v1 = vadd.f32 %v1138_v60, %v1098_v62  ;;  %v1225_v2 = vmax.f32 %v1137_v61, 0.0  ;;  %v5028_v61 = vld [vmem:[#allocation10 + $0x2e8] ss:$16 sps:$4 sm:$0xff]   ;;  %v5033_v63 = vld [vmem:[#allocation10 + $0x2cc] ss:$16 sps:$4 sm:$0xff]  }
 0x1eb   :  { %v1100_v3 = vpop.f32.mrf.mxu0  ;;  %v5031_v0 = vld [vmem:[#allocation10 + $0x2c8] ss:$16 sps:$4 sm:$0xff]  }
 0x1ec   :  { %v1141_v4 = vpop.f32.mrf.mxu1  ;;  %v1226_v5 = vmax.f32 %v1139_v1, 0.0  ;;  %v5770_v8 = vpack.c.bf16 %v1225_v2, %v1225_v2  ;;  %v5036_v1 = vld [vmem:[#allocation10 + $0x2ac] ss:$16 sps:$4 sm:$0xff]   ;;  %v5034_v2 = vld [vmem:[#allocation10 + $0x2a8] ss:$16 sps:$4 sm:$0xff]  }
 0x1ed   :  { %v5039_v3 = vld [vmem:[#allocation10 + $0x28c] ss:$16 sps:$4 sm:$0xff]   ;;  %v5076_v4 = vld [vmem:[#allocation11 + $0xe0] ss:$16 sps:$4 sm:$0xff]  }
 0x1ee   :  { %v1230_v6 = vpack.c.bf16 %v1226_v5, %v1226_v5  ;;  %v5078_v5 = vld [vmem:[#allocation11 + $0xe4] ss:$16 sps:$4 sm:$0xff]  }
 0x1f0   :  { %2055 = vmatprep.mubr.bf16.mxu0 %v1230_v6 }
 0x1f1   :  { %2056 = vmatmul.mubr.bf16.vlgmr.msra.gmra.mxu0 %v5770_v8 }
 0x1f2   :  { %2106 = vmatpush1.bf16.msra.mxu0 %v4935_v7  ;;  %2137 = vmatprep.mubr.bf16.mxu0 %v1230_v6  ;;  %v5081_v6 = vld [vmem:[#allocation11 + $0xc4] ss:$16 sps:$4 sm:$0xff]   ;;  %v5037_v7 = vld [vmem:[#allocation10 + $0x288] ss:$16 sps:$4 sm:$0xff]  }
 0x1f3   :  { %2107 = vmatprep.subr.bf16.mxu0 %v4943_v9  ;;  %v5079_v9 = vld [vmem:[#allocation11 + $0xc0] ss:$16 sps:$4 sm:$0xff]  }
 0x1f6   :  { %2108 = vmatpush1.bf16.msra.mxu0 %v4941_v10  ;;  %v5042_v10 = vld [vmem:[#allocation10 + $0x26c] ss:$16 sps:$4 sm:$0xff]  }
 0x1f7   :  { %2109 = vmatprep.subr.bf16.mxu0 %v4949_v11  ;;  %v5040_v11 = vld [vmem:[#allocation10 + $0x268] ss:$16 sps:$4 sm:$0xff]  }
 0x1fa   :  { %2110 = vmatpush1.bf16.msra.mxu0 %v4947_v12  ;;  %v5082_v12 = vld [vmem:[#allocation11 + $0xa0] ss:$16 sps:$4 sm:$0xff]  }
 0x1fb   :  { %2111 = vmatprep.subr.bf16.mxu0 %v4955_v14  ;;  %v5045_v14 = vld [vmem:[#allocation10 + $0x24c] ss:$16 sps:$4 sm:$0xff]  }
 0x1fe   :  { %2112 = vmatpush1.bf16.msra.mxu0 %v4953_v19  ;;  %v5087_v19 = vld [vmem:[#allocation11 + $0x84] ss:$16 sps:$4 sm:$0xff]  }
 0x1ff   :  { %2113 = vmatprep.subr.bf16.mxu0 %v4961_v20  ;;  %v5043_v20 = vld [vmem:[#allocation10 + $0x248] ss:$16 sps:$4 sm:$0xff]  }
 0x202   :  { %2114 = vmatpush1.bf16.msra.mxu0 %v4959_v21  ;;  %v5085_v21 = vld [vmem:[#allocation11 + $0x80] ss:$16 sps:$4 sm:$0xff]  }
 0x203   :  { %2115 = vmatprep.subr.bf16.mxu0 %v4967_v22  ;;  %v5048_v22 = vld [vmem:[#allocation10 + $0x22c] ss:$16 sps:$4 sm:$0xff]  }
 0x206   :  { %2116 = vmatpush1.bf16.msra.mxu0 %v4965_v23  ;;  %v5090_v23 = vld [vmem:[#allocation11 + $0x64] ss:$16 sps:$4 sm:$0xff]  }
 0x207   :  { %2117 = vmatprep.subr.bf16.mxu0 %v4973_v24  ;;  %v5046_v24 = vld [vmem:[#allocation10 + $0x228] ss:$16 sps:$4 sm:$0xff]  }
 0x20a   :  { %2118 = vmatpush1.bf16.msra.mxu0 %v4971_v25  ;;  %v5088_v25 = vld [vmem:[#allocation11 + $0x60] ss:$16 sps:$4 sm:$0xff]  }
 0x20b   :  { %2119 = vmatprep.subr.bf16.mxu0 %v4979_v26  ;;  %v5051_v26 = vld [vmem:[#allocation10 + $0x20c] ss:$16 sps:$4 sm:$0xff]  }
 0x20e   :  { %2120 = vmatpush1.bf16.msra.mxu0 %v4977_v27  ;;  %v5093_v27 = vld [vmem:[#allocation11 + $0x44] ss:$16 sps:$4 sm:$0xff]  }
 0x20f   :  { %2121 = vmatprep.subr.bf16.mxu0 %v4985_v28  ;;  %v5049_v28 = vld [vmem:[#allocation10 + $0x208] ss:$16 sps:$4 sm:$0xff]  }
 0x212   :  { %2122 = vmatpush2.bf16.msra.mxu0 %v4983_v29  ;;  %v5091_v29 = vld [vmem:[#allocation11 + $0x40] ss:$16 sps:$4 sm:$0xff]  }
 0x213   :  { %2123 = vmatprep.subr.bf16.mxu0 %v4991_v30  ;;  %v5054_v30 = vld [vmem:[#allocation10 + $0x3ec] ss:$16 sps:$4 sm:$0xff]  }
 0x216   :  { %2124 = vmatpush2.bf16.msra.mxu0 %v4989_v31  ;;  %v5096_v31 = vld [vmem:[#allocation11 + $0x24] ss:$16 sps:$4 sm:$0xff]  }
 0x217   :  { %2125 = vmatprep.subr.bf16.mxu0 %v4997_v32  ;;  %v5052_v32 = vld [vmem:[#allocation10 + $0x3e8] ss:$16 sps:$4 sm:$0xff]  }
 0x21a   :  { %2126 = vmatpush2.bf16.msra.mxu0 %v4995_v33  ;;  %v5094_v33 = vld [vmem:[#allocation11 + $0x20] ss:$16 sps:$4 sm:$0xff]  }
 0x21b   :  { %2127 = vmatprep.subr.bf16.mxu0 %v5003_v34  ;;  %v5057_v34 = vld [vmem:[#allocation10 + $0x3cc] ss:$16 sps:$4 sm:$0xff]  }
 0x21e   :  { %2128 = vmatpush2.bf16.msra.mxu0 %v5001_v35  ;;  %v5099_v35 = vld [vmem:[#allocation11 + $0x4] ss:$16 sps:$4 sm:$0xff]  }
 0x21f   :  { %2129 = vmatprep.subr.bf16.mxu0 %v5009_v36  ;;  %v5055_v36 = vld [vmem:[#allocation10 + $0x3c8] ss:$16 sps:$4 sm:$0xff]  }
 0x222   :  { %2130 = vmatpush2.bf16.msra.mxu0 %v5007_v37  ;;  %v5097_v37 = vld [vmem:[#allocation11] ss:$16 sps:$4 sm:$0xff]  }
 0x223   :  { %2131 = vmatprep.subr.bf16.mxu0 %v5015_v38  ;;  %v5060_v38 = vld [vmem:[#allocation10 + $0x3ac] ss:$16 sps:$4 sm:$0xff]  }
 0x225   :  { %v1177_v44 = vpop.f32.mrf.mxu0 }
 0x226   :  { %v1218_v45 = vpop.f32.mrf.mxu1  ;;  %v1178_v47 = vadd.f32 %v1177_v44, %v412_v40  ;;  %2132 = vmatpush2.bf16.msra.mxu0 %v5013_v41  ;;  %v5102_v40 = vld [vmem:[#allocation11 + $0x1e4] ss:$16 sps:$4 sm:$0xff]   ;;  %v5058_v41 = vld [vmem:[#allocation10 + $0x3a8] ss:$16 sps:$4 sm:$0xff]  }
 0x227   :  { %v1179_v49 = vpop.f32.mrf.mxu0  ;;  %2133 = vmatprep.subr.bf16.mxu0 %v5021_v42  ;;  %v5100_v42 = vld [vmem:[#allocation11 + $0x1e0] ss:$16 sps:$4 sm:$0xff]   ;;  %v5105_v44 = vld [vmem:[#allocation11 + $0x1c4] ss:$16 sps:$4 sm:$0xff]  }
 0x228   :  { %v1220_v50 = vpop.f32.mrf.mxu1  ;;  %v1219_v52 = vadd.f32 %v1218_v45, %v1178_v47  ;;  %v1180_v53 = vadd.f32 %v1179_v49, %v416_v43  ;;  %v5063_v43 = vld [vmem:[#allocation10 + $0x38c] ss:$16 sps:$4 sm:$0xff]   ;;  %v5061_v45 = vld [vmem:[#allocation10 + $0x388] ss:$16 sps:$4 sm:$0xff]   ;;  %v5103_v47 = vld [vmem:[#allocation11 + $0x1c0] ss:$16 sps:$4 sm:$0xff]  }
 0x229   :  { %v1181_v54 = vpop.f32.mrf.mxu0  ;;  %v5108_v49 = vld [vmem:[#allocation11 + $0x1a4] ss:$16 sps:$4 sm:$0xff]  }
 0x22a   :  { %v1222_v56 = vpop.f32.mrf.mxu1  ;;  %v1221_v57 = vadd.f32 %v1220_v50, %v1180_v53  ;;  %2134 = vmatpush2.bf16.msra.mxu0 %v5019_v48  ;;  %v1227_v46 = vmax.f32 %v1219_v52, 0.0  ;;  %v5066_v48 = vld [vmem:[#allocation10 + $0x36c] ss:$16 sps:$4 sm:$0xff]   ;;  %v5064_v50 = vld [vmem:[#allocation10 + $0x368] ss:$16 sps:$4 sm:$0xff]  }
 0x22b   :  { %v1182_v59 = vpop.f32.mrf.mxu0  ;;  %2135 = vmatprep.subr.bf16.mxu0 %v5027_v51  ;;  %v5106_v51 = vld [vmem:[#allocation11 + $0x1a0] ss:$16 sps:$4 sm:$0xff]   ;;  %v5069_v52 = vld [vmem:[#allocation10 + $0x34c] ss:$16 sps:$4 sm:$0xff]   ;;  %v5111_v53 = vld [vmem:[#allocation11 + $0x184] ss:$16 sps:$4 sm:$0xff]  }
 0x22c   :  { %v1223_v39 = vpop.f32.mrf.mxu1  ;;  %v1228_v55 = vmax.f32 %v1221_v57, 0.0  ;;  %v5777_v62 = vpack.c.bf16 %v1227_v46, %v1227_v46  ;;  %v5067_v54 = vld [vmem:[#allocation10 + $0x348] ss:$16 sps:$4 sm:$0xff]   ;;  %v5109_v56 = vld [vmem:[#allocation11 + $0x180] ss:$16 sps:$4 sm:$0xff]  }
 0x22d   :  { %v5072_v57 = vld [vmem:[#allocation10 + $0x32c] ss:$16 sps:$4 sm:$0xff]   ;;  %v5070_v46 = vld [vmem:[#allocation10 + $0x328] ss:$16 sps:$4 sm:$0xff]   ;;  %v5112_v59 = vld [vmem:[#allocation11 + $0x160] ss:$16 sps:$4 sm:$0xff]  }
 0x22e   :  { %v1232_v60 = vpack.c.bf16 %v1228_v55, %v1228_v55  ;;  %2136 = vmatpush2.bf16.msra.mxu0 %v5025_v58  ;;  %v5114_v58 = vld [vmem:[#allocation11 + $0x164] ss:$16 sps:$4 sm:$0xff]   ;;  %v5075_v39 = vld [vmem:[#allocation10 + $0x30c] ss:$16 sps:$4 sm:$0xff]  }
 0x22f   :  { %2985 = vmatprep.subr.bf16.mxu0 %v5078_v5  ;;  %v5117_v55 = vld [vmem:[#allocation11 + $0x144] ss:$16 sps:$4 sm:$0xff]   ;;  %v5129_v5 = vld [vmem:[#allocation11 + $0xec] ss:$16 sps:$4 sm:$0xff]  }
 0x230   :  { %2096 = vmatprep.mubr.bf16.mxu1 %v1232_v60 }
 0x231   :  { %2097 = vmatmul.mubr.bf16.vlgmr.msra.gmra.mxu1 %v5777_v62  ;;  %2138 = vmatmul.mubr.bf16.vlgmr.msra.gmra.mxu0 %v5770_v8  ;;  %v5084_v8 = vld [vmem:[#allocation11 + $0xa4] ss:$16 sps:$4 sm:$0xff]  }
 0x232   :  { %2147 = vmatpush1.bf16.msra.mxu1 %v5028_v61  ;;  %2178 = vmatprep.mubr.bf16.mxu1 %v1232_v60  ;;  %v5073_v60 = vld [vmem:[#allocation10 + $0x308] ss:$16 sps:$4 sm:$0xff]   ;;  %v5115_v61 = vld [vmem:[#allocation11 + $0x140] ss:$16 sps:$4 sm:$0xff]  }
 0x233   :  { %2148 = vmatprep.subr.bf16.mxu1 %v5033_v63  ;;  %2986 = vmatpush1.bf16.msra.mxu0 %v5076_v4  ;;  %v5120_v63 = vld [vmem:[#allocation11 + $0x124] ss:$16 sps:$4 sm:$0xff]  }
 0x234   :  { %2987 = vmatprep.subr.bf16.mxu0 %v5081_v6  ;;  %v5126_v4 = vld [vmem:[#allocation11 + $0x2e4] ss:$16 sps:$4 sm:$0xff]   ;;  %v5130_v6 = vld [vmem:[#allocation11 + $0x2c0] ss:$16 sps:$4 sm:$0xff]  }
 0x236   :  { %2149 = vmatpush1.bf16.msra.mxu1 %v5031_v0  ;;  %v5118_v0 = vld [vmem:[#allocation11 + $0x120] ss:$16 sps:$4 sm:$0xff]  }
 0x237   :  { %2150 = vmatprep.subr.bf16.mxu1 %v5036_v1  ;;  %2988 = vmatpush1.bf16.msra.mxu0 %v5079_v9  ;;  %v5123_v1 = vld [vmem:[#allocation11 + $0x104] ss:$16 sps:$4 sm:$0xff]   ;;  %v5136_v9 = vld [vmem:[#allocation11 + $0x2a0] ss:$16 sps:$4 sm:$0xff]  }
 0x238   :  { %2989 = vmatprep.subr.bf16.mxu0 %v5084_v8  ;;  %v5144_v8 = vld [vmem:[#allocation11 + $0x284] ss:$16 sps:$4 sm:$0xff]  }
 0x23a   :  { %2151 = vmatpush1.bf16.msra.mxu1 %v5034_v2  ;;  %v5121_v2 = vld [vmem:[#allocation11 + $0x100] ss:$16 sps:$4 sm:$0xff]  }
 0x23b   :  { %2152 = vmatprep.subr.bf16.mxu1 %v5039_v3  ;;  %2990 = vmatpush1.bf16.msra.mxu0 %v5082_v12  ;;  %v5124_v3 = vld [vmem:[#allocation11 + $0x2e0] ss:$16 sps:$4 sm:$0xff]   ;;  %v5150_v12 = vld [vmem:[#allocation11 + $0x264] ss:$16 sps:$4 sm:$0xff]  }
 0x23c   :  { %2991 = vmatprep.subr.bf16.mxu0 %v5087_v19  ;;  %v5156_v19 = vld [vmem:[#allocation11 + $0x244] ss:$16 sps:$4 sm:$0xff]  }
 0x23e   :  { %2153 = vmatpush1.bf16.msra.mxu1 %v5037_v7  ;;  %v5132_v7 = vld [vmem:[#allocation11 + $0x2c4] ss:$16 sps:$4 sm:$0xff]  }
 0x23f   :  { %2154 = vmatprep.subr.bf16.mxu1 %v5042_v10  ;;  %2992 = vmatpush1.bf16.msra.mxu0 %v5085_v21  ;;  %v5142_v10 = vld [vmem:[#allocation11 + $0x280] ss:$16 sps:$4 sm:$0xff]   ;;  %v5162_v21 = vld [vmem:[#allocation11 + $0x224] ss:$16 sps:$4 sm:$0xff]  }
 0x240   :  { %2993 = vmatprep.subr.bf16.mxu0 %v5090_v23  ;;  %v5168_v23 = vld [vmem:[#allocation11 + $0x204] ss:$16 sps:$4 sm:$0xff]  }
 0x242   :  { %2155 = vmatpush1.bf16.msra.mxu1 %v5040_v11  ;;  %v5148_v11 = vld [vmem:[#allocation11 + $0x260] ss:$16 sps:$4 sm:$0xff]  }
 0x243   :  { %2156 = vmatprep.subr.bf16.mxu1 %v5045_v14  ;;  %2994 = vmatpush1.bf16.msra.mxu0 %v5088_v25  ;;  %v5154_v14 = vld [vmem:[#allocation11 + $0x240] ss:$16 sps:$4 sm:$0xff]   ;;  %v5174_v25 = vld [vmem:[#allocation11 + $0x3e4] ss:$16 sps:$4 sm:$0xff]  }
 0x244   :  { %2995 = vmatprep.subr.bf16.mxu0 %v5093_v27  ;;  %v5180_v27 = vld [vmem:[#allocation11 + $0x3c4] ss:$16 sps:$4 sm:$0xff]  }
 0x246   :  { %2157 = vmatpush1.bf16.msra.mxu1 %v5043_v20  ;;  %v5160_v20 = vld [vmem:[#allocation11 + $0x220] ss:$16 sps:$4 sm:$0xff]  }
 0x247   :  { %2158 = vmatprep.subr.bf16.mxu1 %v5048_v22  ;;  %2996 = vmatpush1.bf16.msra.mxu0 %v5091_v29  ;;  %v5166_v22 = vld [vmem:[#allocation11 + $0x200] ss:$16 sps:$4 sm:$0xff]   ;;  %v5186_v29 = vld [vmem:[#allocation11 + $0x3a4] ss:$16 sps:$4 sm:$0xff]  }
 0x248   :  { %2997 = vmatprep.subr.bf16.mxu0 %v5096_v31  ;;  %v5192_v31 = vld [vmem:[#allocation11 + $0x384] ss:$16 sps:$4 sm:$0xff]  }
 0x24a   :  { %2159 = vmatpush1.bf16.msra.mxu1 %v5046_v24  ;;  %v5172_v24 = vld [vmem:[#allocation11 + $0x3e0] ss:$16 sps:$4 sm:$0xff]  }
 0x24b   :  { %2160 = vmatprep.subr.bf16.mxu1 %v5051_v26  ;;  %2998 = vmatpush1.bf16.msra.mxu0 %v5094_v33  ;;  %v5178_v26 = vld [vmem:[#allocation11 + $0x3c0] ss:$16 sps:$4 sm:$0xff]   ;;  %v5198_v33 = vld [vmem:[#allocation11 + $0x364] ss:$16 sps:$4 sm:$0xff]  }
 0x24c   :  { %2999 = vmatprep.subr.bf16.mxu0 %v5099_v35  ;;  %v5204_v35 = vld [vmem:[#allocation11 + $0x344] ss:$16 sps:$4 sm:$0xff]  }
 0x24e   :  { %2161 = vmatpush1.bf16.msra.mxu1 %v5049_v28  ;;  %v5184_v28 = vld [vmem:[#allocation11 + $0x3a0] ss:$16 sps:$4 sm:$0xff]  }
 0x24f   :  { %2162 = vmatprep.subr.bf16.mxu1 %v5054_v30  ;;  %3000 = vmatpush1.bf16.msra.mxu0 %v5097_v37  ;;  %v5190_v30 = vld [vmem:[#allocation11 + $0x380] ss:$16 sps:$4 sm:$0xff]  }
 0x250   :  { %3001 = vmatprep.subr.bf16.mxu0 %v5102_v40 }
 0x252   :  { %2163 = vmatpush2.bf16.msra.mxu1 %v5052_v32  ;;  %v5196_v32 = vld [vmem:[#allocation11 + $0x360] ss:$16 sps:$4 sm:$0xff]  }
 0x253   :  { %2164 = vmatprep.subr.bf16.mxu1 %v5057_v34  ;;  %3002 = vmatpush2.bf16.msra.mxu0 %v5100_v42  ;;  %v5202_v34 = vld [vmem:[#allocation11 + $0x340] ss:$16 sps:$4 sm:$0xff]  }
 0x254   :  { %3003 = vmatprep.subr.bf16.mxu0 %v5105_v44 }
 0x256   :  { %2165 = vmatpush2.bf16.msra.mxu1 %v5055_v36  ;;  %v5210_v36 = vld [vmem:[#allocation11 + $0x324] ss:$16 sps:$4 sm:$0xff]  }
 0x257   :  { %2166 = vmatprep.subr.bf16.mxu1 %v5060_v38  ;;  %3004 = vmatpush2.bf16.msra.mxu0 %v5103_v47  ;;  %v5208_v38 = vld [vmem:[#allocation11 + $0x320] ss:$16 sps:$4 sm:$0xff]   ;;  %v5785_v47 = vld [vmem:[%s5853_s6] sm:$0xf] }
 0x258   :  { %3005 = vmatprep.subr.bf16.mxu0 %v5108_v49  ;;  %v1370_v49 = vrot.slane %v5785_v47, %v5744_v17 }
 0x25a   :  { %2167 = vmatpush2.bf16.msra.mxu1 %v5058_v41  ;;  %v5216_v41 = vld [vmem:[#allocation11 + $0x304] ss:$16 sps:$4 sm:$0xff]  }
 0x25b   :  { %2168 = vmatprep.subr.bf16.mxu1 %v5063_v43  ;;  %3006 = vmatpush2.bf16.msra.mxu0 %v5106_v51  ;;  %v5214_v43 = vld [vmem:[#allocation11 + $0x300] ss:$16 sps:$4 sm:$0xff]  }
 0x25c   :  { %3007 = vmatprep.subr.bf16.mxu0 %v5111_v53 }
 0x25e   :  { %2169 = vmatpush2.bf16.msra.mxu1 %v5061_v45  ;;  %v5222_v45 = vld [vmem:[#allocation11 + $0x2ec] ss:$16 sps:$4 sm:$0xff]  }
 0x25f   :  { %2170 = vmatprep.subr.bf16.mxu1 %v5066_v48  ;;  %3008 = vmatpush2.bf16.msra.mxu0 %v5109_v56  ;;  %v1366_v48 = vrot.slane %v5785_v47, %v5738_v15 }
 0x260   :  { %3009 = vmatprep.subr.bf16.mxu0 %v5114_v58 }
 0x262   :  { %2171 = vmatpush2.bf16.msra.mxu1 %v5064_v50 }
 0x263   :  { %2172 = vmatprep.subr.bf16.mxu1 %v5069_v52  ;;  %3010 = vmatpush2.bf16.msra.mxu0 %v5112_v59 }
 0x264   :  { %3011 = vmatprep.subr.bf16.mxu0 %v5117_v55 }
 0x266   :  { %2173 = vmatpush2.bf16.msra.mxu1 %v5067_v54 }
 0x267   :  { %2174 = vmatprep.subr.bf16.mxu1 %v5072_v57  ;;  %3012 = vmatpush2.bf16.msra.mxu0 %v5115_v61 }
 0x268   :  { %3013 = vmatprep.subr.bf16.mxu0 %v5120_v63 }
 0x26a   :  { %2175 = vmatpush2.bf16.msra.mxu1 %v5070_v46 }
 0x26b   :  { %2176 = vmatprep.subr.bf16.mxu1 %v5075_v39  ;;  %3014 = vmatpush2.bf16.msra.mxu0 %v5118_v0  ;;  %v5127_v0 = vld [vmem:[#allocation11 + $0xe8] ss:$16 sps:$4 sm:$0xff]  }
 0x26c   :  { %3015 = vmatprep.subr.bf16.mxu0 %v5123_v1 }
 0x26e   :  { %2177 = vmatpush2.bf16.msra.mxu1 %v5073_v60 }
 0x26f   :  { %3016 = vmatpush2.bf16.msra.mxu0 %v5121_v2  ;;  %3026 = vmatprep.subr.bf16.mxu1 %v5126_v4  ;;  %v5135_v2 = vld [vmem:[#allocation11 + $0xcc] ss:$16 sps:$4 sm:$0xff]  }
 0x270   :  { %3067 = vmatprep.subr.bf16.mxu0 %v5129_v5  ;;  %v5141_v4 = vld [vmem:[#allocation11 + $0xac] ss:$16 sps:$4 sm:$0xff]   ;;  %v5139_v5 = vld [vmem:[#allocation11 + $0xa8] ss:$16 sps:$4 sm:$0xff]  }
 0x271   :  { %2179 = vmatmul.mubr.bf16.vlgmr.msra.gmra.mxu1 %v5777_v62  ;;  %v5138_v62 = vld [vmem:[#allocation11 + $0x2a4] ss:$16 sps:$4 sm:$0xff]  }
 0x272   :  { %3027 = vmatpush1.bf16.msra.mxu1 %v5124_v3  ;;  %v5133_v3 = vld [vmem:[#allocation11 + $0xc8] ss:$16 sps:$4 sm:$0xff]  }
 0x273   :  { %3028 = vmatprep.subr.bf16.mxu1 %v5132_v7  ;;  %v5145_v7 = vld [vmem:[#allocation11 + $0x88] ss:$16 sps:$4 sm:$0xff]  }
 0x276   :  { %3029 = vmatpush1.bf16.msra.mxu1 %v5130_v6  ;;  %v5147_v6 = vld [vmem:[#allocation11 + $0x8c] ss:$16 sps:$4 sm:$0xff]  }
 0x277   :  { %3030 = vmatprep.subr.bf16.mxu1 %v5138_v62  ;;  %v5151_v62 = vld [vmem:[#allocation11 + $0x68] ss:$16 sps:$4 sm:$0xff]  }
 0x27a   :  { %3031 = vmatpush1.bf16.msra.mxu1 %v5136_v9  ;;  %v5153_v9 = vld [vmem:[#allocation11 + $0x6c] ss:$16 sps:$4 sm:$0xff]  }
 0x27b   :  { %3032 = vmatprep.subr.bf16.mxu1 %v5144_v8  ;;  %v5157_v8 = vld [vmem:[#allocation11 + $0x48] ss:$16 sps:$4 sm:$0xff]  }
 0x27e   :  { %3033 = vmatpush1.bf16.msra.mxu1 %v5142_v10  ;;  %v5159_v10 = vld [vmem:[#allocation11 + $0x4c] ss:$16 sps:$4 sm:$0xff]  }
 0x27f   :  { %3034 = vmatprep.subr.bf16.mxu1 %v5150_v12  ;;  %v5163_v12 = vld [vmem:[#allocation11 + $0x28] ss:$16 sps:$4 sm:$0xff]  }
 0x282   :  { %3035 = vmatpush1.bf16.msra.mxu1 %v5148_v11  ;;  %v5165_v11 = vld [vmem:[#allocation11 + $0x2c] ss:$16 sps:$4 sm:$0xff]  }
 0x283   :  { %3036 = vmatprep.subr.bf16.mxu1 %v5156_v19  ;;  %v5169_v19 = vld [vmem:[#allocation11 + $0x8] ss:$16 sps:$4 sm:$0xff]  }
 0x286   :  { %3037 = vmatpush1.bf16.msra.mxu1 %v5154_v14  ;;  %v5171_v14 = vld [vmem:[#allocation11 + $0xc] ss:$16 sps:$4 sm:$0xff]  }
 0x287   :  { %3038 = vmatprep.subr.bf16.mxu1 %v5162_v21  ;;  %v5175_v21 = vld [vmem:[#allocation11 + $0x1e8] ss:$16 sps:$4 sm:$0xff]  }
 0x28a   :  { %3039 = vmatpush1.bf16.msra.mxu1 %v5160_v20  ;;  %v5177_v20 = vld [vmem:[#allocation11 + $0x1ec] ss:$16 sps:$4 sm:$0xff]  }
 0x28b   :  { %3040 = vmatprep.subr.bf16.mxu1 %v5168_v23  ;;  %v5181_v23 = vld [vmem:[#allocation11 + $0x1c8] ss:$16 sps:$4 sm:$0xff]  }
 0x28e   :  { %3041 = vmatpush1.bf16.msra.mxu1 %v5166_v22  ;;  %v5183_v22 = vld [vmem:[#allocation11 + $0x1cc] ss:$16 sps:$4 sm:$0xff]  }
 0x28f   :  { %3042 = vmatprep.subr.bf16.mxu1 %v5174_v25  ;;  %v5187_v25 = vld [vmem:[#allocation11 + $0x1a8] ss:$16 sps:$4 sm:$0xff]  }
 0x292   :  { %3043 = vmatpush2.bf16.msra.mxu1 %v5172_v24  ;;  %v5189_v24 = vld [vmem:[#allocation11 + $0x1ac] ss:$16 sps:$4 sm:$0xff]  }
 0x293   :  { %3044 = vmatprep.subr.bf16.mxu1 %v5180_v27  ;;  %v5193_v27 = vld [vmem:[#allocation11 + $0x188] ss:$16 sps:$4 sm:$0xff]  }
 0x296   :  { %3045 = vmatpush2.bf16.msra.mxu1 %v5178_v26  ;;  %v5195_v26 = vld [vmem:[#allocation11 + $0x18c] ss:$16 sps:$4 sm:$0xff]  }
 0x297   :  { %3046 = vmatprep.subr.bf16.mxu1 %v5186_v29  ;;  %v5199_v29 = vld [vmem:[#allocation11 + $0x168] ss:$16 sps:$4 sm:$0xff]  }
 0x29a   :  { %3047 = vmatpush2.bf16.msra.mxu1 %v5184_v28  ;;  %v5201_v28 = vld [vmem:[#allocation11 + $0x16c] ss:$16 sps:$4 sm:$0xff]  }
 0x29b   :  { %3048 = vmatprep.subr.bf16.mxu1 %v5192_v31  ;;  %v1374_v31 = vrot.slane %v5785_v47, %v5741_v16 }
 0x29e   :  { %3049 = vmatpush2.bf16.msra.mxu1 %v5190_v30  ;;  %v5207_v30 = vld [vmem:[#allocation11 + $0x14c] ss:$16 sps:$4 sm:$0xff]  }
 0x29f   :  { %3050 = vmatprep.subr.bf16.mxu1 %v5198_v33  ;;  %v5213_v33 = vld [vmem:[#allocation11 + $0x12c] ss:$16 sps:$4 sm:$0xff]  }
 0x2a2   :  { %3051 = vmatpush2.bf16.msra.mxu1 %v5196_v32  ;;  %v5205_v32 = vld [vmem:[#allocation11 + $0x148] ss:$16 sps:$4 sm:$0xff]  }
 0x2a3   :  { %3052 = vmatprep.subr.bf16.mxu1 %v5204_v35 }
 0x2a6   :  { %3053 = vmatpush2.bf16.msra.mxu1 %v5202_v34  ;;  %v1378_v34 = vrot.slane %v5785_v47, %v5747_v18 }
 0x2a7   :  { %3054 = vmatprep.subr.bf16.mxu1 %v5210_v36  ;;  %v5211_v36 = vld [vmem:[#allocation11 + $0x128] ss:$16 sps:$4 sm:$0xff]  }
 0x2aa   :  { %3055 = vmatpush2.bf16.msra.mxu1 %v5208_v38  ;;  %v5219_v38 = vld [vmem:[#allocation11 + $0x10c] ss:$16 sps:$4 sm:$0xff]  }
 0x2ab   :  { %3056 = vmatprep.subr.bf16.mxu1 %v5216_v41 }
 0x2ae   :  { %3057 = vmatpush2.bf16.msra.mxu1 %v5214_v43 }
 0x2af   :  { %3108 = vmatprep.subr.bf16.mxu1 %v5222_v45 }
 0x2b1   :  { %v2057_v37 = vpop.f32.mrf.mxu0 }
 0x2b2   :  { %v2058_v50 = vadd.f32 %v2057_v37, %v1366_v48 }
 0x2b3   :  { %v2059_v40 = vpop.f32.mrf.mxu0 }
 0x2b4   :  { %v2060_v53 = vadd.f32 %v2059_v40, %v1370_v49 }
 0x2b5   :  { %v2061_v42 = vpop.f32.mrf.mxu0 }
 0x2b7   :  { %v2062_v44 = vpop.f32.mrf.mxu0 }
 0x2b8   :  { %v5217_v44 = vld [vmem:[#allocation11 + $0x108] ss:$16 sps:$4 sm:$0xff]  }
 0x2f1   :  { %v2098_v51 = vpop.f32.mrf.mxu1  ;;  %v5791_v52 = vpop.f32.mrf.mxu0 }
 0x2f2   :  { %v2099_v54 = vadd.f32 %v2098_v51, %v2058_v50  ;;  %v2140_v35 = vadd.f32 %v5791_v52, %v1374_v31  ;;  %v5220_v51 = vld [vmem:[#allocation11 + $0x2e8] ss:$16 sps:$4 sm:$0xff]   ;;  %v5297_v31 = vld [vmem:[#allocation13 + $0x1c4] ss:$16 sps:$4 sm:$0xff]  }
 0x2f3   :  { %v2100_v56 = vpop.f32.mrf.mxu1  ;;  %v5793_v57 = vpop.f32.mrf.mxu0 }
 0x2f4   :  { %v2101_v58 = vadd.f32 %v2100_v56, %v2060_v53  ;;  %v2187_v46 = vmax.f32 %v2099_v54, 0.0  ;;  %v2142_v40 = vadd.f32 %v5793_v57, %v1378_v34  ;;  %v5225_v53 = vld [vmem:[#allocation11 + $0x2cc] ss:$16 sps:$4 sm:$0xff]   ;;  %v5223_v54 = vld [vmem:[#allocation11 + $0x2c8] ss:$16 sps:$4 sm:$0xff]  }
 0x2f5   :  { %v2102_v59 = vpop.f32.mrf.mxu1  ;;  %v2143_v39 = vpop.f32.mrf.mxu0  ;;  %v5228_v56 = vld [vmem:[#allocation11 + $0x2ac] ss:$16 sps:$4 sm:$0xff]   ;;  %v5226_v57 = vld [vmem:[#allocation11 + $0x2a8] ss:$16 sps:$4 sm:$0xff]  }
 0x2f6   :  { %v2188_v55 = vmax.f32 %v2101_v58, 0.0  ;;  %v5795_v1 = vpack.c.bf16 %v2187_v46, %v2187_v46  ;;  %v5231_v58 = vld [vmem:[#allocation11 + $0x28c] ss:$16 sps:$4 sm:$0xff]   ;;  %v5268_v46 = vld [vmem:[#allocation13 + $0xe0] ss:$16 sps:$4 sm:$0xff]  }
 0x2f7   :  { %v2103_v60 = vpop.f32.mrf.mxu1  ;;  %v2144_v61 = vpop.f32.mrf.mxu0  ;;  %v5270_v59 = vld [vmem:[#allocation13 + $0xe4] ss:$16 sps:$4 sm:$0xff]   ;;  %v5258_v34 = vld [vmem:[#allocation11 + $0x36c] ss:$16 sps:$4 sm:$0xff]  }
 0x2f8   :  { %v2192_v63 = vpack.c.bf16 %v2188_v55, %v2188_v55  ;;  %v5273_v39 = vld [vmem:[#allocation13 + $0xc4] ss:$16 sps:$4 sm:$0xff]   ;;  %v5229_v55 = vld [vmem:[#allocation11 + $0x288] ss:$16 sps:$4 sm:$0xff]   ;;  %v5271_v60 = vld [vmem:[#allocation13 + $0xc0] ss:$16 sps:$4 sm:$0xff]  }
 0x2f9   :  { %v5234_v61 = vld [vmem:[#allocation11 + $0x26c] ss:$16 sps:$4 sm:$0xff]  }
 0x2fa   :  { %3017 = vmatprep.mubr.bf16.mxu0 %v2192_v63 }
 0x2fb   :  { %3018 = vmatmul.mubr.bf16.vlgmr.msra.gmra.mxu0 %v5795_v1 }
 0x2fc   :  { %3068 = vmatpush1.bf16.msra.mxu0 %v5127_v0  ;;  %3099 = vmatprep.mubr.bf16.mxu0 %v2192_v63  ;;  %v5276_v63 = vld [vmem:[#allocation13 + $0xa4] ss:$16 sps:$4 sm:$0xff]   ;;  %v5232_v0 = vld [vmem:[#allocation11 + $0x268] ss:$16 sps:$4 sm:$0xff]  }
 0x2fd   :  { %3069 = vmatprep.subr.bf16.mxu0 %v5135_v2  ;;  %v5237_v2 = vld [vmem:[#allocation11 + $0x24c] ss:$16 sps:$4 sm:$0xff]  }
 0x300   :  { %3070 = vmatpush1.bf16.msra.mxu0 %v5133_v3  ;;  %v5279_v3 = vld [vmem:[#allocation13 + $0x84] ss:$16 sps:$4 sm:$0xff]  }
 0x301   :  { %3071 = vmatprep.subr.bf16.mxu0 %v5141_v4  ;;  %v5235_v4 = vld [vmem:[#allocation11 + $0x248] ss:$16 sps:$4 sm:$0xff]  }
 0x304   :  { %3072 = vmatpush1.bf16.msra.mxu0 %v5139_v5  ;;  %v5277_v5 = vld [vmem:[#allocation13 + $0x80] ss:$16 sps:$4 sm:$0xff]  }
 0x305   :  { %3073 = vmatprep.subr.bf16.mxu0 %v5147_v6  ;;  %v5240_v6 = vld [vmem:[#allocation11 + $0x22c] ss:$16 sps:$4 sm:$0xff]  }
 0x308   :  { %3074 = vmatpush1.bf16.msra.mxu0 %v5145_v7  ;;  %v5282_v7 = vld [vmem:[#allocation13 + $0x64] ss:$16 sps:$4 sm:$0xff]  }
 0x309   :  { %3075 = vmatprep.subr.bf16.mxu0 %v5153_v9  ;;  %v5238_v9 = vld [vmem:[#allocation11 + $0x228] ss:$16 sps:$4 sm:$0xff]  }
 0x30c   :  { %3076 = vmatpush1.bf16.msra.mxu0 %v5151_v62  ;;  %v5280_v62 = vld [vmem:[#allocation13 + $0x60] ss:$16 sps:$4 sm:$0xff]  }
 0x30d   :  { %3077 = vmatprep.subr.bf16.mxu0 %v5159_v10  ;;  %v5243_v10 = vld [vmem:[#allocation11 + $0x20c] ss:$16 sps:$4 sm:$0xff]  }
 0x310   :  { %3078 = vmatpush1.bf16.msra.mxu0 %v5157_v8  ;;  %v5285_v8 = vld [vmem:[#allocation13 + $0x44] ss:$16 sps:$4 sm:$0xff]  }
 0x311   :  { %3079 = vmatprep.subr.bf16.mxu0 %v5165_v11  ;;  %v5241_v11 = vld [vmem:[#allocation11 + $0x208] ss:$16 sps:$4 sm:$0xff]  }
 0x314   :  { %3080 = vmatpush1.bf16.msra.mxu0 %v5163_v12  ;;  %v5283_v12 = vld [vmem:[#allocation13 + $0x40] ss:$16 sps:$4 sm:$0xff]  }
 0x315   :  { %3081 = vmatprep.subr.bf16.mxu0 %v5171_v14  ;;  %v5246_v14 = vld [vmem:[#allocation11 + $0x3ec] ss:$16 sps:$4 sm:$0xff]  }
 0x318   :  { %3082 = vmatpush1.bf16.msra.mxu0 %v5169_v19  ;;  %v5288_v19 = vld [vmem:[#allocation13 + $0x24] ss:$16 sps:$4 sm:$0xff]  }
 0x319   :  { %3083 = vmatprep.subr.bf16.mxu0 %v5177_v20  ;;  %v5244_v20 = vld [vmem:[#allocation11 + $0x3e8] ss:$16 sps:$4 sm:$0xff]  }
 0x31c   :  { %3084 = vmatpush2.bf16.msra.mxu0 %v5175_v21  ;;  %v5286_v21 = vld [vmem:[#allocation13 + $0x20] ss:$16 sps:$4 sm:$0xff]  }
 0x31d   :  { %3085 = vmatprep.subr.bf16.mxu0 %v5183_v22  ;;  %v5249_v22 = vld [vmem:[#allocation11 + $0x3cc] ss:$16 sps:$4 sm:$0xff]  }
 0x320   :  { %3086 = vmatpush2.bf16.msra.mxu0 %v5181_v23  ;;  %v5291_v23 = vld [vmem:[#allocation13 + $0x4] ss:$16 sps:$4 sm:$0xff]  }
 0x321   :  { %3087 = vmatprep.subr.bf16.mxu0 %v5189_v24  ;;  %v5247_v24 = vld [vmem:[#allocation11 + $0x3c8] ss:$16 sps:$4 sm:$0xff]  }
 0x324   :  { %3088 = vmatpush2.bf16.msra.mxu0 %v5187_v25  ;;  %v5289_v25 = vld [vmem:[#allocation13] ss:$16 sps:$4 sm:$0xff]  }
 0x325   :  { %3089 = vmatprep.subr.bf16.mxu0 %v5195_v26  ;;  %v5252_v26 = vld [vmem:[#allocation11 + $0x3ac] ss:$16 sps:$4 sm:$0xff]  }
 0x328   :  { %3090 = vmatpush2.bf16.msra.mxu0 %v5193_v27  ;;  %v5294_v27 = vld [vmem:[#allocation13 + $0x1e4] ss:$16 sps:$4 sm:$0xff]  }
 0x329   :  { %3091 = vmatprep.subr.bf16.mxu0 %v5201_v28  ;;  %v5250_v28 = vld [vmem:[#allocation11 + $0x3a8] ss:$16 sps:$4 sm:$0xff]  }
 0x32c   :  { %3092 = vmatpush2.bf16.msra.mxu0 %v5199_v29  ;;  %v5292_v29 = vld [vmem:[#allocation13 + $0x1e0] ss:$16 sps:$4 sm:$0xff]  }
 0x32d   :  { %3093 = vmatprep.subr.bf16.mxu0 %v5207_v30  ;;  %v5255_v30 = vld [vmem:[#allocation11 + $0x38c] ss:$16 sps:$4 sm:$0xff]  }
 0x330   :  { %3094 = vmatpush2.bf16.msra.mxu0 %v5205_v32  ;;  %v5253_v32 = vld [vmem:[#allocation11 + $0x388] ss:$16 sps:$4 sm:$0xff]  }
 0x331   :  { %v2180_v37 = vpop.f32.mrf.mxu1  ;;  %3095 = vmatprep.subr.bf16.mxu0 %v5213_v33  ;;  %v5295_v33 = vld [vmem:[#allocation13 + $0x1c0] ss:$16 sps:$4 sm:$0xff]  }
 0x332   :  { %v2181_v41 = vadd.f32 %v2180_v37, %v2140_v35  ;;  %v5300_v35 = vld [vmem:[#allocation13 + $0x1a4] ss:$16 sps:$4 sm:$0xff]   ;;  %v5298_v37 = vld [vmem:[#allocation13 + $0x1a0] ss:$16 sps:$4 sm:$0xff]  }
 0x333   :  { %v2182_v42 = vpop.f32.mrf.mxu1 }
 0x334   :  { %v2183_v43 = vadd.f32 %v2182_v42, %v2142_v40  ;;  %3096 = vmatpush2.bf16.msra.mxu0 %v5211_v36  ;;  %v2189_v45 = vmax.f32 %v2181_v41, 0.0  ;;  %v5256_v36 = vld [vmem:[#allocation11 + $0x368] ss:$16 sps:$4 sm:$0xff]   ;;  %v5303_v40 = vld [vmem:[#allocation13 + $0x184] ss:$16 sps:$4 sm:$0xff]  }
 0x335   :  { %v2184_v48 = vpop.f32.mrf.mxu1  ;;  %3097 = vmatprep.subr.bf16.mxu0 %v5219_v38  ;;  %v5261_v38 = vld [vmem:[#allocation11 + $0x34c] ss:$16 sps:$4 sm:$0xff]   ;;  %v5259_v41 = vld [vmem:[#allocation11 + $0x348] ss:$16 sps:$4 sm:$0xff]   ;;  %v5301_v42 = vld [vmem:[#allocation13 + $0x180] ss:$16 sps:$4 sm:$0xff]  }
 0x336   :  { %v2190_v49 = vmax.f32 %v2183_v43, 0.0  ;;  %v5804_v52 = vpack.c.bf16 %v2189_v45, %v2189_v45  ;;  %v5264_v43 = vld [vmem:[#allocation11 + $0x32c] ss:$16 sps:$4 sm:$0xff]   ;;  %v5262_v45 = vld [vmem:[#allocation11 + $0x328] ss:$16 sps:$4 sm:$0xff]  }
 0x337   :  { %v2185_v50 = vpop.f32.mrf.mxu1  ;;  %v5304_v48 = vld [vmem:[#allocation13 + $0x160] ss:$16 sps:$4 sm:$0xff]  }
 0x338   :  { %v2194_v47 = vpack.c.bf16 %v2190_v49, %v2190_v49  ;;  %3098 = vmatpush2.bf16.msra.mxu0 %v5217_v44  ;;  %v5306_v44 = vld [vmem:[#allocation13 + $0x164] ss:$16 sps:$4 sm:$0xff]   ;;  %v5267_v49 = vld [vmem:[#allocation11 + $0x30c] ss:$16 sps:$4 sm:$0xff]  }
 0x339   :  { %3947 = vmatprep.subr.bf16.mxu0 %v5270_v59  ;;  %v5309_v50 = vld [vmem:[#allocation13 + $0x144] ss:$16 sps:$4 sm:$0xff]   ;;  %v5321_v59 = vld [vmem:[#allocation13 + $0xec] ss:$16 sps:$4 sm:$0xff]  }
 0x33a   :  { %3058 = vmatprep.mubr.bf16.mxu1 %v2194_v47 }
 0x33b   :  { %3059 = vmatmul.mubr.bf16.vlgmr.msra.gmra.mxu1 %v5804_v52  ;;  %3100 = vmatmul.mubr.bf16.vlgmr.msra.gmra.mxu0 %v5795_v1  ;;  %v5274_v1 = vld [vmem:[#allocation13 + $0xa0] ss:$16 sps:$4 sm:$0xff]  }
 0x33c   :  { %3109 = vmatpush1.bf16.msra.mxu1 %v5220_v51  ;;  %3140 = vmatprep.mubr.bf16.mxu1 %v2194_v47  ;;  %v5265_v47 = vld [vmem:[#allocation11 + $0x308] ss:$16 sps:$4 sm:$0xff]   ;;  %v5307_v51 = vld [vmem:[#allocation13 + $0x140] ss:$16 sps:$4 sm:$0xff]  }
 0x33d   :  { %3110 = vmatprep.subr.bf16.mxu1 %v5225_v53  ;;  %3948 = vmatpush1.bf16.msra.mxu0 %v5268_v46  ;;  %v5312_v53 = vld [vmem:[#allocation13 + $0x124] ss:$16 sps:$4 sm:$0xff]  }
 0x33e   :  { %3949 = vmatprep.subr.bf16.mxu0 %v5273_v39  ;;  %v5318_v46 = vld [vmem:[#allocation13 + $0x2e4] ss:$16 sps:$4 sm:$0xff]   ;;  %v5322_v39 = vld [vmem:[#allocation13 + $0x2c0] ss:$16 sps:$4 sm:$0xff]  }
 0x340   :  { %3111 = vmatpush1.bf16.msra.mxu1 %v5223_v54  ;;  %v5310_v54 = vld [vmem:[#allocation13 + $0x120] ss:$16 sps:$4 sm:$0xff]  }
 0x341   :  { %3112 = vmatprep.subr.bf16.mxu1 %v5228_v56  ;;  %3950 = vmatpush1.bf16.msra.mxu0 %v5271_v60  ;;  %v5315_v56 = vld [vmem:[#allocation13 + $0x104] ss:$16 sps:$4 sm:$0xff]   ;;  %v5328_v60 = vld [vmem:[#allocation13 + $0x2a0] ss:$16 sps:$4 sm:$0xff]  }
 0x342   :  { %3951 = vmatprep.subr.bf16.mxu0 %v5276_v63  ;;  %v5336_v63 = vld [vmem:[#allocation13 + $0x284] ss:$16 sps:$4 sm:$0xff]  }
 0x344   :  { %3113 = vmatpush1.bf16.msra.mxu1 %v5226_v57  ;;  %v5313_v57 = vld [vmem:[#allocation13 + $0x100] ss:$16 sps:$4 sm:$0xff]  }
 0x345   :  { %3114 = vmatprep.subr.bf16.mxu1 %v5231_v58  ;;  %3952 = vmatpush1.bf16.msra.mxu0 %v5274_v1  ;;  %v5316_v58 = vld [vmem:[#allocation13 + $0x2e0] ss:$16 sps:$4 sm:$0xff]   ;;  %v5342_v1 = vld [vmem:[#allocation13 + $0x264] ss:$16 sps:$4 sm:$0xff]  }
 0x346   :  { %3953 = vmatprep.subr.bf16.mxu0 %v5279_v3  ;;  %v5348_v3 = vld [vmem:[#allocation13 + $0x244] ss:$16 sps:$4 sm:$0xff]  }
 0x348   :  { %3115 = vmatpush1.bf16.msra.mxu1 %v5229_v55  ;;  %v5324_v55 = vld [vmem:[#allocation13 + $0x2c4] ss:$16 sps:$4 sm:$0xff]  }
 0x349   :  { %3116 = vmatprep.subr.bf16.mxu1 %v5234_v61  ;;  %3954 = vmatpush1.bf16.msra.mxu0 %v5277_v5  ;;  %v5334_v61 = vld [vmem:[#allocation13 + $0x280] ss:$16 sps:$4 sm:$0xff]   ;;  %v5354_v5 = vld [vmem:[#allocation13 + $0x224] ss:$16 sps:$4 sm:$0xff]  }
 0x34a   :  { %3955 = vmatprep.subr.bf16.mxu0 %v5282_v7  ;;  %v5360_v7 = vld [vmem:[#allocation13 + $0x204] ss:$16 sps:$4 sm:$0xff]  }
 0x34c   :  { %3117 = vmatpush1.bf16.msra.mxu1 %v5232_v0  ;;  %v5340_v0 = vld [vmem:[#allocation13 + $0x260] ss:$16 sps:$4 sm:$0xff]  }
 0x34d   :  { %3118 = vmatprep.subr.bf16.mxu1 %v5237_v2  ;;  %3956 = vmatpush1.bf16.msra.mxu0 %v5280_v62  ;;  %v5346_v2 = vld [vmem:[#allocation13 + $0x240] ss:$16 sps:$4 sm:$0xff]   ;;  %v5366_v62 = vld [vmem:[#allocation13 + $0x3e4] ss:$16 sps:$4 sm:$0xff]  }
 0x34e   :  { %3957 = vmatprep.subr.bf16.mxu0 %v5285_v8  ;;  %v5372_v8 = vld [vmem:[#allocation13 + $0x3c4] ss:$16 sps:$4 sm:$0xff]  }
 0x350   :  { %3119 = vmatpush1.bf16.msra.mxu1 %v5235_v4  ;;  %v5352_v4 = vld [vmem:[#allocation13 + $0x220] ss:$16 sps:$4 sm:$0xff]  }
 0x351   :  { %3120 = vmatprep.subr.bf16.mxu1 %v5240_v6  ;;  %3958 = vmatpush1.bf16.msra.mxu0 %v5283_v12  ;;  %v5358_v6 = vld [vmem:[#allocation13 + $0x200] ss:$16 sps:$4 sm:$0xff]   ;;  %v5378_v12 = vld [vmem:[#allocation13 + $0x3a4] ss:$16 sps:$4 sm:$0xff]  }
 0x352   :  { %3959 = vmatprep.subr.bf16.mxu0 %v5288_v19  ;;  %v5384_v19 = vld [vmem:[#allocation13 + $0x384] ss:$16 sps:$4 sm:$0xff]  }
 0x354   :  { %3121 = vmatpush1.bf16.msra.mxu1 %v5238_v9  ;;  %v5364_v9 = vld [vmem:[#allocation13 + $0x3e0] ss:$16 sps:$4 sm:$0xff]  }
 0x355   :  { %3122 = vmatprep.subr.bf16.mxu1 %v5243_v10  ;;  %3960 = vmatpush1.bf16.msra.mxu0 %v5286_v21  ;;  %v5370_v10 = vld [vmem:[#allocation13 + $0x3c0] ss:$16 sps:$4 sm:$0xff]   ;;  %v5390_v21 = vld [vmem:[#allocation13 + $0x364] ss:$16 sps:$4 sm:$0xff]  }
 0x356   :  { %3961 = vmatprep.subr.bf16.mxu0 %v5291_v23  ;;  %v5396_v23 = vld [vmem:[#allocation13 + $0x344] ss:$16 sps:$4 sm:$0xff]  }
 0x358   :  { %3123 = vmatpush1.bf16.msra.mxu1 %v5241_v11  ;;  %v5376_v11 = vld [vmem:[#allocation13 + $0x3a0] ss:$16 sps:$4 sm:$0xff]  }
 0x359   :  { %3124 = vmatprep.subr.bf16.mxu1 %v5246_v14  ;;  %3962 = vmatpush1.bf16.msra.mxu0 %v5289_v25  ;;  %v5382_v14 = vld [vmem:[#allocation13 + $0x380] ss:$16 sps:$4 sm:$0xff]  }
 0x35a   :  { %3963 = vmatprep.subr.bf16.mxu0 %v5294_v27 }
 0x35c   :  { %3125 = vmatpush2.bf16.msra.mxu1 %v5244_v20  ;;  %v5388_v20 = vld [vmem:[#allocation13 + $0x360] ss:$16 sps:$4 sm:$0xff]  }
 0x35d   :  { %3126 = vmatprep.subr.bf16.mxu1 %v5249_v22  ;;  %3964 = vmatpush2.bf16.msra.mxu0 %v5292_v29  ;;  %v5394_v22 = vld [vmem:[#allocation13 + $0x340] ss:$16 sps:$4 sm:$0xff]  }
 0x35e   :  { %3965 = vmatprep.subr.bf16.mxu0 %v5297_v31 }
 0x360   :  { %3127 = vmatpush2.bf16.msra.mxu1 %v5247_v24  ;;  %v5402_v24 = vld [vmem:[#allocation13 + $0x324] ss:$16 sps:$4 sm:$0xff]  }
 0x361   :  { %3128 = vmatprep.subr.bf16.mxu1 %v5252_v26  ;;  %3966 = vmatpush2.bf16.msra.mxu0 %v5295_v33  ;;  %v5400_v26 = vld [vmem:[#allocation13 + $0x320] ss:$16 sps:$4 sm:$0xff]   ;;  %v5812_v33 = vld [vmem:[%s5855_s8] sm:$0xf] }
 0x362   :  { %3967 = vmatprep.subr.bf16.mxu0 %v5300_v35  ;;  %v2332_v35 = vrot.slane %v5812_v33, %v5744_v17 }
 0x364   :  { %3129 = vmatpush2.bf16.msra.mxu1 %v5250_v28  ;;  %v5408_v28 = vld [vmem:[#allocation13 + $0x304] ss:$16 sps:$4 sm:$0xff]  }
 0x365   :  { %3130 = vmatprep.subr.bf16.mxu1 %v5255_v30  ;;  %3968 = vmatpush2.bf16.msra.mxu0 %v5298_v37  ;;  %v5406_v30 = vld [vmem:[#allocation13 + $0x300] ss:$16 sps:$4 sm:$0xff]  }
 0x366   :  { %3969 = vmatprep.subr.bf16.mxu0 %v5303_v40 }
 0x368   :  { %3131 = vmatpush2.bf16.msra.mxu1 %v5253_v32  ;;  %v5414_v32 = vld [vmem:[#allocation13 + $0x2ec] ss:$16 sps:$4 sm:$0xff]  }
 0x369   :  { %3132 = vmatprep.subr.bf16.mxu1 %v5258_v34  ;;  %3970 = vmatpush2.bf16.msra.mxu0 %v5301_v42  ;;  %v2328_v34 = vrot.slane %v5812_v33, %v5738_v15 }
 0x36a   :  { %3971 = vmatprep.subr.bf16.mxu0 %v5306_v44 }
 0x36c   :  { %3133 = vmatpush2.bf16.msra.mxu1 %v5256_v36 }
 0x36d   :  { %3134 = vmatprep.subr.bf16.mxu1 %v5261_v38  ;;  %3972 = vmatpush2.bf16.msra.mxu0 %v5304_v48 }
 0x36e   :  { %3973 = vmatprep.subr.bf16.mxu0 %v5309_v50 }
 0x370   :  { %3135 = vmatpush2.bf16.msra.mxu1 %v5259_v41 }
 0x371   :  { %3136 = vmatprep.subr.bf16.mxu1 %v5264_v43  ;;  %3974 = vmatpush2.bf16.msra.mxu0 %v5307_v51 }
 0x372   :  { %3975 = vmatprep.subr.bf16.mxu0 %v5312_v53 }
 0x374   :  { %3137 = vmatpush2.bf16.msra.mxu1 %v5262_v45 }
 0x375   :  { %3138 = vmatprep.subr.bf16.mxu1 %v5267_v49  ;;  %3976 = vmatpush2.bf16.msra.mxu0 %v5310_v54  ;;  %v5319_v54 = vld [vmem:[#allocation13 + $0xe8] ss:$16 sps:$4 sm:$0xff]  }
 0x376   :  { %3977 = vmatprep.subr.bf16.mxu0 %v5315_v56 }
 0x378   :  { %3139 = vmatpush2.bf16.msra.mxu1 %v5265_v47 }
 0x379   :  { %3978 = vmatpush2.bf16.msra.mxu0 %v5313_v57  ;;  %3988 = vmatprep.subr.bf16.mxu1 %v5318_v46  ;;  %v5327_v57 = vld [vmem:[#allocation13 + $0xcc] ss:$16 sps:$4 sm:$0xff]  }
 0x37a   :  { %4029 = vmatprep.subr.bf16.mxu0 %v5321_v59  ;;  %v5333_v46 = vld [vmem:[#allocation13 + $0xac] ss:$16 sps:$4 sm:$0xff]   ;;  %v5331_v59 = vld [vmem:[#allocation13 + $0xa8] ss:$16 sps:$4 sm:$0xff]  }
 0x37b   :  { %3141 = vmatmul.mubr.bf16.vlgmr.msra.gmra.mxu1 %v5804_v52  ;;  %v5330_v52 = vld [vmem:[#allocation13 + $0x2a4] ss:$16 sps:$4 sm:$0xff]  }
 0x37c   :  { %3989 = vmatpush1.bf16.msra.mxu1 %v5316_v58  ;;  %v5325_v58 = vld [vmem:[#allocation13 + $0xc8] ss:$16 sps:$4 sm:$0xff]  }
 0x37d   :  { %3990 = vmatprep.subr.bf16.mxu1 %v5324_v55  ;;  %v5337_v55 = vld [vmem:[#allocation13 + $0x88] ss:$16 sps:$4 sm:$0xff]  }
 0x380   :  { %3991 = vmatpush1.bf16.msra.mxu1 %v5322_v39  ;;  %v5339_v39 = vld [vmem:[#allocation13 + $0x8c] ss:$16 sps:$4 sm:$0xff]  }
 0x381   :  { %3992 = vmatprep.subr.bf16.mxu1 %v5330_v52  ;;  %v5343_v52 = vld [vmem:[#allocation13 + $0x68] ss:$16 sps:$4 sm:$0xff]  }
 0x384   :  { %3993 = vmatpush1.bf16.msra.mxu1 %v5328_v60  ;;  %v5345_v60 = vld [vmem:[#allocation13 + $0x6c] ss:$16 sps:$4 sm:$0xff]  }
 0x385   :  { %3994 = vmatprep.subr.bf16.mxu1 %v5336_v63  ;;  %v5349_v63 = vld [vmem:[#allocation13 + $0x48] ss:$16 sps:$4 sm:$0xff]  }
 0x388   :  { %3995 = vmatpush1.bf16.msra.mxu1 %v5334_v61  ;;  %v5351_v61 = vld [vmem:[#allocation13 + $0x4c] ss:$16 sps:$4 sm:$0xff]  }
 0x389   :  { %3996 = vmatprep.subr.bf16.mxu1 %v5342_v1  ;;  %v5355_v1 = vld [vmem:[#allocation13 + $0x28] ss:$16 sps:$4 sm:$0xff]  }
 0x38c   :  { %3997 = vmatpush1.bf16.msra.mxu1 %v5340_v0  ;;  %v5357_v0 = vld [vmem:[#allocation13 + $0x2c] ss:$16 sps:$4 sm:$0xff]  }
 0x38d   :  { %3998 = vmatprep.subr.bf16.mxu1 %v5348_v3  ;;  %v5361_v3 = vld [vmem:[#allocation13 + $0x8] ss:$16 sps:$4 sm:$0xff]  }
 0x390   :  { %3999 = vmatpush1.bf16.msra.mxu1 %v5346_v2  ;;  %v5363_v2 = vld [vmem:[#allocation13 + $0xc] ss:$16 sps:$4 sm:$0xff]  }
 0x391   :  { %4000 = vmatprep.subr.bf16.mxu1 %v5354_v5  ;;  %v5367_v5 = vld [vmem:[#allocation13 + $0x1e8] ss:$16 sps:$4 sm:$0xff]  }
 0x394   :  { %4001 = vmatpush1.bf16.msra.mxu1 %v5352_v4  ;;  %v5369_v4 = vld [vmem:[#allocation13 + $0x1ec] ss:$16 sps:$4 sm:$0xff]  }
 0x395   :  { %4002 = vmatprep.subr.bf16.mxu1 %v5360_v7  ;;  %v5373_v7 = vld [vmem:[#allocation13 + $0x1c8] ss:$16 sps:$4 sm:$0xff]  }
 0x398   :  { %4003 = vmatpush1.bf16.msra.mxu1 %v5358_v6  ;;  %v5375_v6 = vld [vmem:[#allocation13 + $0x1cc] ss:$16 sps:$4 sm:$0xff]  }
 0x399   :  { %4004 = vmatprep.subr.bf16.mxu1 %v5366_v62  ;;  %v5379_v62 = vld [vmem:[#allocation13 + $0x1a8] ss:$16 sps:$4 sm:$0xff]  }
 0x39c   :  { %4005 = vmatpush2.bf16.msra.mxu1 %v5364_v9  ;;  %v5381_v9 = vld [vmem:[#allocation13 + $0x1ac] ss:$16 sps:$4 sm:$0xff]  }
 0x39d   :  { %4006 = vmatprep.subr.bf16.mxu1 %v5372_v8  ;;  %v5385_v8 = vld [vmem:[#allocation13 + $0x188] ss:$16 sps:$4 sm:$0xff]  }
 0x3a0   :  { %4007 = vmatpush2.bf16.msra.mxu1 %v5370_v10  ;;  %v5387_v10 = vld [vmem:[#allocation13 + $0x18c] ss:$16 sps:$4 sm:$0xff]  }
 0x3a1   :  { %4008 = vmatprep.subr.bf16.mxu1 %v5378_v12  ;;  %v5391_v12 = vld [vmem:[#allocation13 + $0x168] ss:$16 sps:$4 sm:$0xff]  }
 0x3a4   :  { %4009 = vmatpush2.bf16.msra.mxu1 %v5376_v11  ;;  %v5393_v11 = vld [vmem:[#allocation13 + $0x16c] ss:$16 sps:$4 sm:$0xff]  }
 0x3a5   :  { %4010 = vmatprep.subr.bf16.mxu1 %v5384_v19  ;;  %v2336_v19 = vrot.slane %v5812_v33, %v5741_v16 }
 0x3a8   :  { %4011 = vmatpush2.bf16.msra.mxu1 %v5382_v14  ;;  %v5399_v14 = vld [vmem:[#allocation13 + $0x14c] ss:$16 sps:$4 sm:$0xff]  }
 0x3a9   :  { %4012 = vmatprep.subr.bf16.mxu1 %v5390_v21  ;;  %v5405_v21 = vld [vmem:[#allocation13 + $0x12c] ss:$16 sps:$4 sm:$0xff]  }
 0x3ac   :  { %4013 = vmatpush2.bf16.msra.mxu1 %v5388_v20  ;;  %v5397_v20 = vld [vmem:[#allocation13 + $0x148] ss:$16 sps:$4 sm:$0xff]  }
 0x3ad   :  { %4014 = vmatprep.subr.bf16.mxu1 %v5396_v23 }
 0x3b0   :  { %4015 = vmatpush2.bf16.msra.mxu1 %v5394_v22  ;;  %v2340_v22 = vrot.slane %v5812_v33, %v5747_v18 }
 0x3b1   :  { %4016 = vmatprep.subr.bf16.mxu1 %v5402_v24  ;;  %v5403_v24 = vld [vmem:[#allocation13 + $0x128] ss:$16 sps:$4 sm:$0xff]  }
 0x3b4   :  { %4017 = vmatpush2.bf16.msra.mxu1 %v5400_v26  ;;  %v5411_v26 = vld [vmem:[#allocation13 + $0x10c] ss:$16 sps:$4 sm:$0xff]  }
 0x3b5   :  { %4018 = vmatprep.subr.bf16.mxu1 %v5408_v28 }
 0x3b8   :  { %4019 = vmatpush2.bf16.msra.mxu1 %v5406_v30 }
 0x3b9   :  { %4070 = vmatprep.subr.bf16.mxu1 %v5414_v32 }
 0x3bb   :  { %v3019_v25 = vpop.f32.mrf.mxu0 }
 0x3bc   :  { %v3020_v36 = vadd.f32 %v3019_v25, %v2328_v34 }
 0x3bd   :  { %v3021_v27 = vpop.f32.mrf.mxu0 }
 0x3be   :  { %v3022_v40 = vadd.f32 %v3021_v27, %v2332_v35 }
 0x3bf   :  { %v3023_v29 = vpop.f32.mrf.mxu0 }
 0x3c1   :  { %v3024_v31 = vpop.f32.mrf.mxu0 }
 0x3c2   :  { %v5409_v31 = vld [vmem:[#allocation13 + $0x108] ss:$16 sps:$4 sm:$0xff]  }
 0x3fb   :  { %v3060_v37 = vpop.f32.mrf.mxu1  ;;  %v5818_v38 = vpop.f32.mrf.mxu0 }
 0x3fc   :  { %v3061_v41 = vadd.f32 %v3060_v37, %v3020_v36  ;;  %v3102_v23 = vadd.f32 %v5818_v38, %v2336_v19  ;;  %v5412_v37 = vld [vmem:[#allocation13 + $0x2e8] ss:$16 sps:$4 sm:$0xff]  }
 0x3fd   :  { %v3062_v42 = vpop.f32.mrf.mxu1  ;;  %v5820_v43 = vpop.f32.mrf.mxu0 }
 0x3fe   :  { %v3063_v44 = vadd.f32 %v3062_v42, %v3022_v40  ;;  %v3149_v45 = vmax.f32 %v3061_v41, 0.0  ;;  %v3104_v27 = vadd.f32 %v5820_v43, %v2340_v22  ;;  %v5417_v40 = vld [vmem:[#allocation13 + $0x2cc] ss:$16 sps:$4 sm:$0xff]   ;;  %v5415_v41 = vld [vmem:[#allocation13 + $0x2c8] ss:$16 sps:$4 sm:$0xff]  }
 0x3ff   :  { %v3064_v48 = vpop.f32.mrf.mxu1  ;;  %v3105_v49 = vpop.f32.mrf.mxu0  ;;  %v5420_v42 = vld [vmem:[#allocation13 + $0x2ac] ss:$16 sps:$4 sm:$0xff]   ;;  %v5418_v43 = vld [vmem:[#allocation13 + $0x2a8] ss:$16 sps:$4 sm:$0xff]  }
 0x400   :  { %v3150_v50 = vmax.f32 %v3063_v44, 0.0  ;;  %v5822_v56 = vpack.c.bf16 %v3149_v45, %v3149_v45  ;;  %v5423_v44 = vld [vmem:[#allocation13 + $0x28c] ss:$16 sps:$4 sm:$0xff]   ;;  %v5421_v45 = vld [vmem:[#allocation13 + $0x288] ss:$16 sps:$4 sm:$0xff]  }
 0x401   :  { %v3065_v47 = vpop.f32.mrf.mxu1  ;;  %v3106_v51 = vpop.f32.mrf.mxu0  ;;  %v5426_v48 = vld [vmem:[#allocation13 + $0x26c] ss:$16 sps:$4 sm:$0xff]   ;;  %v5424_v49 = vld [vmem:[#allocation13 + $0x268] ss:$16 sps:$4 sm:$0xff]  }
 0x402   :  { %v3154_v53 = vpack.c.bf16 %v3150_v50, %v3150_v50  ;;  %v5429_v50 = vld [vmem:[#allocation13 + $0x24c] ss:$16 sps:$4 sm:$0xff]   ;;  %v5427_v47 = vld [vmem:[#allocation13 + $0x248] ss:$16 sps:$4 sm:$0xff]  }
 0x403   :  { %v5432_v51 = vld [vmem:[#allocation13 + $0x22c] ss:$16 sps:$4 sm:$0xff]  }
 0x404   :  { %3979 = vmatprep.mubr.bf16.mxu0 %v3154_v53 }
 0x405   :  { %3980 = vmatmul.mubr.bf16.vlgmr.msra.gmra.mxu0 %v5822_v56 }
 0x406   :  { %4030 = vmatpush1.bf16.msra.mxu0 %v5319_v54  ;;  %4061 = vmatprep.mubr.bf16.mxu0 %v3154_v53  ;;  %v5430_v53 = vld [vmem:[#allocation13 + $0x228] ss:$16 sps:$4 sm:$0xff]   ;;  %v5435_v54 = vld [vmem:[#allocation13 + $0x20c] ss:$16 sps:$4 sm:$0xff]  }
 0x407   :  { %4031 = vmatprep.subr.bf16.mxu0 %v5327_v57  ;;  %v5438_v57 = vld [vmem:[#allocation13 + $0x3ec] ss:$16 sps:$4 sm:$0xff]  }
 0x40a   :  { %4032 = vmatpush1.bf16.msra.mxu0 %v5325_v58  ;;  %v5436_v58 = vld [vmem:[#allocation13 + $0x3e8] ss:$16 sps:$4 sm:$0xff]  }
 0x40b   :  { %4033 = vmatprep.subr.bf16.mxu0 %v5333_v46  ;;  %v5441_v46 = vld [vmem:[#allocation13 + $0x3cc] ss:$16 sps:$4 sm:$0xff]  }
 0x40e   :  { %4034 = vmatpush1.bf16.msra.mxu0 %v5331_v59  ;;  %v5439_v59 = vld [vmem:[#allocation13 + $0x3c8] ss:$16 sps:$4 sm:$0xff]  }
 0x40f   :  { %4035 = vmatprep.subr.bf16.mxu0 %v5339_v39  ;;  %v5444_v39 = vld [vmem:[#allocation13 + $0x3ac] ss:$16 sps:$4 sm:$0xff]  }
 0x412   :  { %4036 = vmatpush1.bf16.msra.mxu0 %v5337_v55  ;;  %v5442_v55 = vld [vmem:[#allocation13 + $0x3a8] ss:$16 sps:$4 sm:$0xff]  }
 0x413   :  { %4037 = vmatprep.subr.bf16.mxu0 %v5345_v60  ;;  %v5447_v60 = vld [vmem:[#allocation13 + $0x38c] ss:$16 sps:$4 sm:$0xff]  }
 0x416   :  { %4038 = vmatpush1.bf16.msra.mxu0 %v5343_v52  ;;  %v5445_v52 = vld [vmem:[#allocation13 + $0x388] ss:$16 sps:$4 sm:$0xff]  }
 0x417   :  { %4039 = vmatprep.subr.bf16.mxu0 %v5351_v61  ;;  %v5450_v61 = vld [vmem:[#allocation13 + $0x36c] ss:$16 sps:$4 sm:$0xff]  }
 0x41a   :  { %4040 = vmatpush1.bf16.msra.mxu0 %v5349_v63  ;;  %v5448_v63 = vld [vmem:[#allocation13 + $0x368] ss:$16 sps:$4 sm:$0xff]  }
 0x41b   :  { %4041 = vmatprep.subr.bf16.mxu0 %v5357_v0  ;;  %v5453_v0 = vld [vmem:[#allocation13 + $0x34c] ss:$16 sps:$4 sm:$0xff]  }
 0x41e   :  { %4042 = vmatpush1.bf16.msra.mxu0 %v5355_v1  ;;  %v5451_v1 = vld [vmem:[#allocation13 + $0x348] ss:$16 sps:$4 sm:$0xff]  }
 0x41f   :  { %4043 = vmatprep.subr.bf16.mxu0 %v5363_v2  ;;  %v5456_v2 = vld [vmem:[#allocation13 + $0x32c] ss:$16 sps:$4 sm:$0xff]  }
 0x422   :  { %4044 = vmatpush1.bf16.msra.mxu0 %v5361_v3  ;;  %v5454_v3 = vld [vmem:[#allocation13 + $0x328] ss:$16 sps:$4 sm:$0xff]  }
 0x423   :  { %4045 = vmatprep.subr.bf16.mxu0 %v5369_v4  ;;  %v5459_v4 = vld [vmem:[#allocation13 + $0x30c] ss:$16 sps:$4 sm:$0xff]  }
 0x426   :  { %4046 = vmatpush2.bf16.msra.mxu0 %v5367_v5  ;;  %v5457_v5 = vld [vmem:[#allocation13 + $0x308] ss:$16 sps:$4 sm:$0xff]  }
 0x427   :  { %4047 = vmatprep.subr.bf16.mxu0 %v5375_v6 }
 0x42a   :  { %4048 = vmatpush2.bf16.msra.mxu0 %v5373_v7 }
 0x42b   :  { %4049 = vmatprep.subr.bf16.mxu0 %v5381_v9 }
 0x42e   :  { %4050 = vmatpush2.bf16.msra.mxu0 %v5379_v62 }
 0x42f   :  { %4051 = vmatprep.subr.bf16.mxu0 %v5387_v10  ;;  %v3285_v10 = vld [vmem:[%s5857_s10] sm:$0xf]  ;;  %s5641_s10 = smov [#allocation14]  }
 0x430   :  { %s4144_s14 = sshll.u32 %s5641_s10, 4  ;;  %s4145_s14 = int_to_ptr.vmem [resolvable:$true] %s4144_s14 }
 0x431   :  { %s5600_s15 = scalar_lea.vmem %s4145_s14, 128  ;;  %p5605_p8 = scmp.lt.s32.totalorder %s4145_s14, %s4145_s14 }
 0x432   :  { %4052 = vmatpush2.bf16.msra.mxu0 %v5385_v8  ;;  %v3290_v8 = vrot.slane %v3285_v10, %v5738_v15  ;;  %v5640_v15 = vmov 1983009808   ;;  %p5601_p7 = scmp.ne.s32.totalorder %s4145_s14, %s5600_s15  ;;  %p5606_p9 = scmp.lt.s32.totalorder %s5600_s15, %s5600_s15 }
 0x433   :  { %4053 = vmatprep.subr.bf16.mxu0 %v5393_v11  ;;  %v3294_v11 = vrot.slane %v3285_v10, %v5744_v17  ;;  %v3302_v17 = vrot.slane %v3285_v10, %v5747_v18 }
 0x434   :  { %p5607_p10 = por %p5606_p9, %p5605_p8 }
 0x436   :  { %4054 = vmatpush2.bf16.msra.mxu0 %v5391_v12  ;;  %p5608_p11 = pnand %p5607_p10, %p5601_p7 }
 0x437   :  { %4055 = vmatprep.subr.bf16.mxu0 %v5399_v14 }
 0x43a   :  { %4056 = vmatpush2.bf16.msra.mxu0 %v5397_v20 }
 0x43b   :  { %v3142_v25 = vpop.f32.mrf.mxu1  ;;  %4057 = vmatprep.subr.bf16.mxu0 %v5405_v21 }
 0x43c   :  { %v3143_v28 = vadd.f32 %v3142_v25, %v3102_v23 }
 0x43d   :  { %v3144_v29 = vpop.f32.mrf.mxu1 }
 0x43e   :  { %v3145_v30 = vadd.f32 %v3144_v29, %v3104_v27  ;;  %4058 = vmatpush2.bf16.msra.mxu0 %v5403_v24  ;;  %v3151_v32 = vmax.f32 %v3143_v28, 0.0 }
 0x43f   :  { %v3146_v34 = vpop.f32.mrf.mxu1  ;;  %4059 = vmatprep.subr.bf16.mxu0 %v5411_v26 }
 0x440   :  { %v3152_v35 = vmax.f32 %v3145_v30, 0.0  ;;  %v5831_v38 = vpack.c.bf16 %v3151_v32, %v3151_v32  ;;  %v3298_v32 = vrot.slane %v3285_v10, %v5741_v16  ;;  %v4122_v34 = vunpack.c.l.s4 %v5640_v15 }
 0x441   :  { %v3147_v36 = vpop.f32.mrf.mxu1 }
 0x442   :  { %v3156_v33 = vpack.c.bf16 %v3152_v35, %v3152_v35  ;;  %4060 = vmatpush2.bf16.msra.mxu0 %v5409_v31 }
 0x444   :  { %4020 = vmatprep.mubr.bf16.mxu1 %v3156_v33 }
 0x445   :  { %4021 = vmatmul.mubr.bf16.vlgmr.msra.gmra.mxu1 %v5831_v38  ;;  %4062 = vmatmul.mubr.bf16.vlgmr.msra.gmra.mxu0 %v5822_v56  ;;  %v5433_v56 = vld [vmem:[#allocation13 + $0x208] ss:$16 sps:$4 sm:$0xff]  }
 0x446   :  { %4071 = vmatpush1.bf16.msra.mxu1 %v5412_v37  ;;  %4102 = vmatprep.mubr.bf16.mxu1 %v3156_v33  ;;  %v4123_v33 = vunpack.c.0.s8 %v4122_v34 }
 0x447   :  { %4072 = vmatprep.subr.bf16.mxu1 %v5417_v40 }
 0x44a   :  { %4073 = vmatpush1.bf16.msra.mxu1 %v5415_v41 }
 0x44b   :  { %4074 = vmatprep.subr.bf16.mxu1 %v5420_v42 }
 0x44e   :  { %4075 = vmatpush1.bf16.msra.mxu1 %v5418_v43  ;;  %v4126_v43 = vsub.s32 %v4123_v33, %v5735_v13 }
 0x44f   :  { %4076 = vmatprep.subr.bf16.mxu1 %v5423_v44 }
 0x452   :  { %4077 = vmatpush1.bf16.msra.mxu1 %v5421_v45 }
 0x453   :  { %4078 = vmatprep.subr.bf16.mxu1 %v5426_v48 }
 0x456   :  { %4079 = vmatpush1.bf16.msra.mxu1 %v5424_v49 }
 0x457   :  { %4080 = vmatprep.subr.bf16.mxu1 %v5429_v50 }
 0x45a   :  { %4081 = vmatpush1.bf16.msra.mxu1 %v5427_v47 }
 0x45b   :  { %4082 = vmatprep.subr.bf16.mxu1 %v5432_v51 }
 0x45e   :  { %4083 = vmatpush1.bf16.msra.mxu1 %v5430_v53 }
 0x45f   :  { %4084 = vmatprep.subr.bf16.mxu1 %v5435_v54 }
 0x462   :  { %4085 = vmatpush1.bf16.msra.mxu1 %v5433_v56 }
 0x463   :  { %4086 = vmatprep.subr.bf16.mxu1 %v5438_v57 }
 0x466   :  { %4087 = vmatpush2.bf16.msra.mxu1 %v5436_v58 }
 0x467   :  { %4088 = vmatprep.subr.bf16.mxu1 %v5441_v46 }
 0x46a   :  { %4089 = vmatpush2.bf16.msra.mxu1 %v5439_v59 }
 0x46b   :  { %4090 = vmatprep.subr.bf16.mxu1 %v5444_v39 }
 0x46e   :  { %4091 = vmatpush2.bf16.msra.mxu1 %v5442_v55 }
 0x46f   :  { %4092 = vmatprep.subr.bf16.mxu1 %v5447_v60 }
 0x472   :  { %4093 = vmatpush2.bf16.msra.mxu1 %v5445_v52 }
 0x473   :  { %4094 = vmatprep.subr.bf16.mxu1 %v5450_v61 }
 0x476   :  { %4095 = vmatpush2.bf16.msra.mxu1 %v5448_v63 }
 0x477   :  { %4096 = vmatprep.subr.bf16.mxu1 %v5453_v0 }
 0x47a   :  { %4097 = vmatpush2.bf16.msra.mxu1 %v5451_v1 }
 0x47b   :  { %4098 = vmatprep.subr.bf16.mxu1 %v5456_v2 }
 0x47e   :  { %4099 = vmatpush2.bf16.msra.mxu1 %v5454_v3 }
 0x47f   :  { %4100 = vmatprep.subr.bf16.mxu1 %v5459_v4 }
 0x482   :  { %4101 = vmatpush2.bf16.msra.mxu1 %v5457_v5 }
 0x485   :  { %4103 = vmatmul.mubr.bf16.vlgmr.msra.gmra.mxu1 %v5831_v38 }
 0x4c5   :  { %v3981_v6 = vpop.f32.mrf.mxu0 }
 0x4c6   :  { %v3982_v12 = vadd.f32 %v3981_v6, %v3290_v8 }
 0x4c7   :  { %v3983_v7 = vpop.f32.mrf.mxu0 }
 0x4c8   :  { %v3984_v20 = vadd.f32 %v3983_v7, %v3294_v11 }
 0x4c9   :  { %v3985_v9 = vpop.f32.mrf.mxu0 }
 0x4cb   :  { %v3986_v62 = vpop.f32.mrf.mxu0 }
 0x505   :  { %v4022_v14 = vpop.f32.mrf.mxu1  ;;  %v4063_v19 = vpop.f32.mrf.mxu0 }
 0x506   :  { %v4023_v21 = vadd.f32 %v4022_v14, %v3982_v12  ;;  %v4064_v35 = vadd.f32 %v4063_v19, %v3298_v32 }
 0x507   :  { %v4024_v22 = vpop.f32.mrf.mxu1  ;;  %v4065_v23 = vpop.f32.mrf.mxu0 }
 0x508   :  { %v4025_v24 = vadd.f32 %v4024_v22, %v3984_v20  ;;  %v4111_v27 = vmax.f32 %v4023_v21, 0.0  ;;  %v4066_v37 = vadd.f32 %v4065_v23, %v3302_v17 }
 0x509   :  { %v4026_v25 = vpop.f32.mrf.mxu1  ;;  %v4067_v26 = vpop.f32.mrf.mxu0 }
 0x50a   :  { %v4112_v28 = vmax.f32 %v4025_v24, 0.0 }
 0x50b   :  { %v4027_v29 = vpop.f32.mrf.mxu1  ;;  %v4068_v30 = vpop.f32.mrf.mxu0 }
 0x50c   :  { %v4119_v31 = vcombine.low %v4111_v27, %v4112_v28 }
 0x50e   :  { %v4127_v16 = vrot.slane %v4119_v31, %v4126_v43 }
 0x545   :  { %v4104_v36 = vpop.f32.mrf.mxu1 }
 0x546   :  { %v4105_v38 = vadd.f32 %v4104_v36, %v4064_v35 }
 0x547   :  { %v4106_v40 = vpop.f32.mrf.mxu1 }
 0x548   :  { %v4107_v41 = vadd.f32 %v4106_v40, %v4066_v37  ;;  %v4113_v44 = vmax.f32 %v4105_v38, 0.0 }
 0x549   :  { %v4108_v42 = vpop.f32.mrf.mxu1 }
 0x54a   :  { %v4114_v45 = vmax.f32 %v4107_v41, 0.0 }
 0x54b   :  { %v4109_v48 = vpop.f32.mrf.mxu1 }
 0x54c   :  { %v4120_v49 = vcombine.low %v4113_v44, %v4114_v45 }
 0x54e   :  { %v4134_v50 = vrot.slane %v4120_v49, %v4126_v43 }
 0x550   :  { %v4135_v47 = vcombine.low %v4127_v16, %v4134_v50 }
 0x552   :  { %4137 = vst [vmem:[#allocation14] sm:$0xff] %v4135_v47 }
 0x553   :  { %5611 = shalt.err (!%p5608_p11)
}
 0x554   :  { %4147 = dma.vmem_to_hbm [thread:$0]  %s4145_s14, 128, %s5858_s11, [#allocation4]  }
 0x555   :  { %5628 = dma.done.wait [#allocation4], 128  }
 0x556   :  { %5629 = vsyncadd [#allocation4], 4294967168 }
 0x557   :  { %4151 = vsyncpa [#allocation3], 1 }
 0x558   :  { %4152 = vsyncpa [#allocation6], 1 }
 0x559   :  { %4153 = vsyncpa [#allocation9], 1 }
 0x55a   :  { %4154 = vsyncpa [#allocation12], 1 }
 0x55b   :  { %4155 = vsyncpa [#allocation4], 1 }

</bundles_post_ra>
